<compile_context>
chip_gen: v7x
topology: tpu7x:2x2x1
jax: 0.10.0
libtpu: 0.0.40
codegen_flags: <defaults>
</compile_context>

<pallas_src>
import functools

import jax
import jax.numpy as jnp
from jax.experimental import pallas as pl
from jax.experimental.pallas import tpu as pltpu


CFG = dict(
    vocab=256,
    hidden=128,
    heads=4,
    head_dim=32,
    ffn=256,
    layers=2,
    rope_theta=10000.0,
    eps=1e-6,
)

_VMEM_LIMIT = 32 * 1024 * 1024  # safe on v5e / v6e / v7x


def _pick_row_tile(M):
    """Largest row tile (multiple of 8) that divides M."""
    for t in (512, 256, 128, 64, 32, 16, 8):
        if M % t == 0:
            return t
    return M


# --------------------------- fused attention block ---------------------------

def _attn_block_kernel(x_ref, nw_ref, wqkv_ref, wo_ref, cos_ref, sin_ref, o_ref,
                       *, H, Hd, eps):
    # x_ref: [T, D] (one batch element), weights bf16, norm/cos/sin fp32.
    x = x_ref[...].astype(jnp.float32)                      # [T, D]
    T = x.shape[0]
    HHd = H * Hd

    # RMSNorm (fp32)
    var = jnp.mean(x * x, axis=-1, keepdims=True)
    xn = x * jax.lax.rsqrt(var + eps) * nw_ref[...]         # [T, D]

    # fused QKV projection: bf16 MXU inputs, fp32 accumulator
    qkv = jnp.dot(xn.astype(jnp.bfloat16), wqkv_ref[...],
                  preferred_element_type=jnp.float32)       # [T, 3*H*Hd] fp32

    cos = cos_ref[...]                                      # [T, Hd]
    sin = sin_ref[...]
    half = Hd // 2
    scale = 1.0 / (Hd ** 0.5)

    def rope(t):                                            # t: [T, Hd]
        t1 = t[:, :half]
        t2 = t[:, half:]
        rot = jnp.concatenate([-t2, t1], axis=-1)
        return t * cos + rot * sin

    # causal mask (shared across heads)
    qi = jax.lax.broadcasted_iota(jnp.int32, (T, T), 0)
    ki = jax.lax.broadcasted_iota(jnp.int32, (T, T), 1)
    causal = ki <= qi

    heads_out = []
    for h in range(H):
        qh = rope(qkv[:, h * Hd:(h + 1) * Hd]) * scale      # scale folded into q
        kh = rope(qkv[:, HHd + h * Hd: HHd + (h + 1) * Hd])
        vh = qkv[:, 2 * HHd + h * Hd: 2 * HHd + (h + 1) * Hd]

        # q @ k^T without materializing a transpose (contract last dims)
        s = jax.lax.dot_general(
            qh.astype(jnp.bfloat16), kh.astype(jnp.bfloat16),
            dimension_numbers=(((1,), (1,)), ((), ())),
            preferred_element_type=jnp.float32)             # [T, T] fp32
        s = jnp.where(causal, s, jnp.float32(-1e30))

        m = jnp.max(s, axis=-1, keepdims=True)
        p = jnp.exp(s - m)
        denom = jnp.sum(p, axis=-1, keepdims=True)
        p = p * pl.reciprocal(denom, approx=True)

        heads_out.append(
            jnp.dot(p.astype(jnp.bfloat16), vh.astype(jnp.bfloat16),
                    preferred_element_type=jnp.float32))    # [T, Hd]

    attn = jnp.concatenate(heads_out, axis=-1)              # [T, H*Hd]
    out = jnp.dot(attn.astype(jnp.bfloat16), wo_ref[...],
                  preferred_element_type=jnp.float32)       # [T, D]
    o_ref[...] = (x + out).astype(o_ref.dtype)              # fused residual add


def attn_block(x, norm_w, wqkv, wo, cos, sin, cfg):
    B, T, D = x.shape
    H, Hd = cfg["heads"], cfg["head_dim"]
    return pl.pallas_call(
        functools.partial(_attn_block_kernel, H=H, Hd=Hd, eps=cfg["eps"]),
        out_shape=jax.ShapeDtypeStruct((B, T, D), jnp.float32),
        grid=(B,),
        in_specs=[
            pl.BlockSpec((None, T, D), lambda b: (b, 0, 0)),   # x (per batch)
            pl.BlockSpec((1, D), lambda b: (0, 0)),            # input norm
            pl.BlockSpec((D, 3 * H * Hd), lambda b: (0, 0)),   # fused wqkv
            pl.BlockSpec((H * Hd, D), lambda b: (0, 0)),       # wo
            pl.BlockSpec((T, Hd), lambda b: (0, 0)),           # cos
            pl.BlockSpec((T, Hd), lambda b: (0, 0)),           # sin
        ],
        out_specs=pl.BlockSpec((None, T, D), lambda b: (b, 0, 0)),
        compiler_params=pltpu.CompilerParams(
            dimension_semantics=("parallel",),
            vmem_limit_bytes=_VMEM_LIMIT,
        ),
    )(x, norm_w.reshape(1, D), wqkv, wo, cos, sin)


# ----------------------------- fused MLP block -------------------------------

def _mlp_block_kernel(x_ref, nw_ref, wgu_ref, wd_ref, o_ref, *, F, eps):
    x = x_ref[...].astype(jnp.float32)                       # [TM, D]
    var = jnp.mean(x * x, axis=-1, keepdims=True)
    xn = x * jax.lax.rsqrt(var + eps) * nw_ref[...]
    gu = jnp.dot(xn.astype(jnp.bfloat16), wgu_ref[...],
                 preferred_element_type=jnp.float32)         # [TM, 2F]
    g = gu[:, :F]
    u = gu[:, F:]
    act = g * jax.lax.logistic(g) * u                        # SwiGLU, fp32 VPU/EUP
    out = jnp.dot(act.astype(jnp.bfloat16), wd_ref[...],
                  preferred_element_type=jnp.float32)        # [TM, D]
    o_ref[...] = (x + out).astype(o_ref.dtype)               # fused residual add


def mlp_block(x2d, norm_w, w_gate_up, w_down, cfg):
    M, D = x2d.shape
    F = cfg["ffn"]
    tm = _pick_row_tile(M)
    return pl.pallas_call(
        functools.partial(_mlp_block_kernel, F=F, eps=cfg["eps"]),
        out_shape=jax.ShapeDtypeStruct((M, D), jnp.float32),
        grid=(M // tm,),
        in_specs=[
            pl.BlockSpec((tm, D), lambda i: (i, 0)),
            pl.BlockSpec((1, D), lambda i: (0, 0)),
            pl.BlockSpec((D, 2 * F), lambda i: (0, 0)),
            pl.BlockSpec((F, D), lambda i: (0, 0)),
        ],
        out_specs=pl.BlockSpec((tm, D), lambda i: (i, 0)),
        compiler_params=pltpu.CompilerParams(
            dimension_semantics=("parallel",),
            vmem_limit_bytes=_VMEM_LIMIT,
        ),
    )(x2d, norm_w.reshape(1, D), w_gate_up, w_down)


# --------------------------- final norm + lm head ----------------------------

def _final_head_kernel(x_ref, nw_ref, wl_ref, o_ref, *, eps):
    x = x_ref[...].astype(jnp.float32)
    var = jnp.mean(x * x, axis=-1, keepdims=True)
    xn = x * jax.lax.rsqrt(var + eps) * nw_ref[...]
    o_ref[...] = jnp.dot(xn.astype(jnp.bfloat16), wl_ref[...],
                         preferred_element_type=jnp.float32)


def final_head(x2d, norm_w, lm_head, cfg):
    M, D = x2d.shape
    V = cfg["vocab"]
    tm = _pick_row_tile(M)
    return pl.pallas_call(
        functools.partial(_final_head_kernel, eps=cfg["eps"]),
        out_shape=jax.ShapeDtypeStruct((M, V), jnp.float32),
        grid=(M // tm,),
        in_specs=[
            pl.BlockSpec((tm, D), lambda i: (i, 0)),
            pl.BlockSpec((1, D), lambda i: (0, 0)),
            pl.BlockSpec((D, V), lambda i: (0, 0)),
        ],
        out_specs=pl.BlockSpec((tm, V), lambda i: (i, 0)),
        compiler_params=pltpu.CompilerParams(
            dimension_semantics=("parallel",),
            vmem_limit_bytes=_VMEM_LIMIT,
        ),
    )(x2d, norm_w.reshape(1, D), lm_head)


# ------------------------------ model (glue) ---------------------------------

def init_params(key, cfg):
    D, H, Hd = cfg["hidden"], cfg["heads"], cfg["head_dim"]
    F, V, L = cfg["ffn"], cfg["vocab"], cfg["layers"]
    HHd = H * Hd
    keys = jax.random.split(key, 2 + 4 * L)
    scale = 0.05

    def w(k, shape, dtype=jnp.bfloat16):
        return (scale * jax.random.normal(k, shape, dtype=jnp.float32)).astype(dtype)

    params = {
        "embed": w(keys[0], (V, D), jnp.float32),
        "lm_head": w(keys[1], (D, V)),             # bf16, lane-dense V=256
        "final_norm": jnp.ones((D,), jnp.float32),
        "layers": [],
    }
    ki = 2
    for _ in range(L):
        lk = keys[ki:ki + 4]
        ki += 4
        params["layers"].append(dict(
            wqkv=w(lk[0], (D, 3 * HHd)),           # fused q/k/v weight
            wo=w(lk[1], (HHd, D)),
            w_gate_up=w(lk[2], (D, 2 * F)),        # fused gate/up weight
            w_down=w(lk[3], (F, D)),
            input_norm=jnp.ones((D,), jnp.float32),
            post_norm=jnp.ones((D,), jnp.float32),
        ))
    return params


def rope_tables(S, Hd, theta):
    half = Hd // 2
    inv_freq = 1.0 / (theta ** (jnp.arange(0, half, dtype=jnp.float32) * 2.0 / Hd))
    t = jnp.arange(S, dtype=jnp.float32)
    freqs = jnp.outer(t, inv_freq)               # [S, Hd//2]
    emb = jnp.concatenate([freqs, freqs], -1)    # [S, Hd]
    return jnp.cos(emb), jnp.sin(emb)


def decoder_forward(params, token_ids, cfg):
    """token_ids: [B, T] int32 -> logits [B, T, V] (causal; padding after the
    valid prefix cannot influence earlier positions)."""
    B, T = token_ids.shape
    D, Hd, V = cfg["hidden"], cfg["head_dim"], cfg["vocab"]

    # TODO(synk): embedding gather left to XLA (data-dependent row gather).
    x = jnp.take(params["embed"], token_ids, axis=0)        # [B, T, D] fp32
    cos, sin = rope_tables(T, Hd, cfg["rope_theta"])

    for lyr in params["layers"]:
        x = attn_block(x, lyr["input_norm"], lyr["wqkv"], lyr["wo"], cos, sin, cfg)
        x = mlp_block(x.reshape(B * T, D), lyr["post_norm"],
                      lyr["w_gate_up"], lyr["w_down"], cfg).reshape(B, T, D)

    logits = final_head(x.reshape(B * T, D), params["final_norm"],
                        params["lm_head"], cfg).reshape(B, T, V)
    return logits


def make_decode_step(cfg):
    @jax.jit
    def step(params, ids_buf, cur_len):
        logits = decoder_forward(params, ids_buf, cfg)                    # [B, T, V]
        last = jax.lax.dynamic_slice_in_dim(logits, cur_len - 1, 1, axis=1)[:, 0, :]
        next_tok = jnp.argmax(last, axis=-1).astype(jnp.int32)            # [B]
        return jax.lax.dynamic_update_slice(ids_buf, next_tok[:, None], (0, cur_len))
    return step


def generate(params, prompt_ids, cfg, max_new_tokens, total_len):
    """Greedy decode over a fixed-length buffer (compiles once, no retracing).

    Mirrors model.generate(...) in the reference module, minus sampling."""
    B, S = prompt_ids.shape
    assert S + max_new_tokens <= total_len
    ids_buf = jnp.zeros((B, total_len), jnp.int32)
    ids_buf = jax.lax.dynamic_update_slice(ids_buf, prompt_ids, (0, 0))
    step = make_decode_step(cfg)
    for i in range(max_new_tokens):
        ids_buf = step(params, ids_buf, jnp.array(S + i, dtype=jnp.int32))
    return ids_buf[:, :S + max_new_tokens]


# ---------------------------------- main --------------------------------------

if __name__ == "__main__":
    key = jax.random.PRNGKey(0)
    pkey, dkey = jax.random.split(key)

    params = init_params(pkey, CFG)

    B, S = 2, 8
    max_new = 4
    total_len = 16   # fixed padded sequence length (multiple of 8)
    prompt_ids = jax.random.randint(dkey, (B, S), 0, CFG["vocab"], dtype=jnp.int32)

    # one fixed-shape forward over the padded buffer (the generate() hot path)
    ids_buf = jnp.zeros((B, total_len), jnp.int32)
    ids_buf = jax.lax.dynamic_update_slice(ids_buf, prompt_ids, (0, 0))
    fwd = jax.jit(functools.partial(decoder_forward, cfg=CFG))
    logits = fwd(params, ids_buf)

    # short greedy generation (single compiled decode step reused each token)
    out_ids = generate(params, prompt_ids, CFG, max_new_tokens=max_new,
                       total_len=total_len)

    jax.block_until_ready(logits)
    jax.block_until_ready(out_ids)

    assert logits.shape == (B, total_len, CFG["vocab"])
    assert out_ids.shape == (B, S + max_new)
    assert bool(jnp.all(jnp.isfinite(logits)))

    print("KERNEL_OK")
</pallas_src>

<mosaic_0001>
module attributes {stable_mosaic.version = 11 : i64} {
  func.func @_mlp_block_kernel(%arg0: i32, %arg1: memref<32x128xf32, #tpu.memory_space<vmem>>, %arg2: memref<1x128xf32, #tpu.memory_space<vmem>>, %arg3: memref<128x512xbf16, #tpu.memory_space<vmem>>, %arg4: memref<256x128xbf16, #tpu.memory_space<vmem>>, %arg5: memref<32x128xf32, #tpu.memory_space<vmem>>) attributes {dimension_semantics = [#tpu.dimension_semantics<parallel>], iteration_bounds = array<i64: 1>, scalar_prefetch = 0 : i64, scratch_operands = 0 : i64, tpu.core_type = #tpu.core_type<tc>, window_params = [{transform_indices = @transform_0, window_bounds = array<i64: 32, 128>}, {pipeline_mode = #tpu.pipeline_mode<synchronous>, transform_indices = @transform_1, window_bounds = array<i64: 1, 128>}, {pipeline_mode = #tpu.pipeline_mode<synchronous>, transform_indices = @transform_2, window_bounds = array<i64: 128, 512>}, {pipeline_mode = #tpu.pipeline_mode<synchronous>, transform_indices = @transform_3, window_bounds = array<i64: 256, 128>}, {transform_indices = @transform_4, window_bounds = array<i64: 32, 128>}]} {
    %c0 = arith.constant 0 : index
    %c0_0 = arith.constant 0 : index
    %0 = vector.load %arg1[%c0, %c0_0] : memref<32x128xf32, #tpu.memory_space<vmem>>, vector<32x128xf32>
    %1 = arith.mulf %0, %0 : vector<32x128xf32>
    %cst = arith.constant dense<0.000000e+00> : vector<32xf32>
    %2 = vector.multi_reduction <add>, %1, %cst [1] : vector<32x128xf32> to vector<32xf32>
    %3 = vector.shape_cast %2 : vector<32xf32> to vector<32x1xf32>
    %cst_1 = arith.constant 1.280000e+02 : f32
    %4 = vector.broadcast %cst_1 : f32 to vector<32x1xf32>
    %5 = arith.divf %3, %4 : vector<32x1xf32>
    %cst_2 = arith.constant 9.99999997E-7 : f32
    %6 = vector.broadcast %cst_2 : f32 to vector<32x1xf32>
    %7 = arith.addf %5, %6 : vector<32x1xf32>
    %8 = math.rsqrt %7 : vector<32x1xf32>
    %9 = vector.broadcast %8 : vector<32x1xf32> to vector<32x128xf32>
    %10 = arith.mulf %0, %9 : vector<32x128xf32>
    %c0_3 = arith.constant 0 : index
    %c0_4 = arith.constant 0 : index
    %11 = vector.load %arg2[%c0_3, %c0_4] : memref<1x128xf32, #tpu.memory_space<vmem>>, vector<1x128xf32>
    %12 = vector.broadcast %11 : vector<1x128xf32> to vector<32x128xf32>
    %13 = arith.mulf %10, %12 : vector<32x128xf32>
    %14 = arith.truncf %13 : vector<32x128xf32> to vector<32x128xbf16>
    %c0_5 = arith.constant 0 : index
    %c0_6 = arith.constant 0 : index
    %15 = vector.load %arg3[%c0_5, %c0_6] : memref<128x512xbf16, #tpu.memory_space<vmem>>, vector<128x512xbf16>
    %cst_7 = arith.constant dense<0.000000e+00> : vector<32x512xf32>
    %16 = tpu.matmul %14, %15, %cst_7 {dimension_numbers = #tpu.dot_dimension_numbers<[1], [0], [0], [1], [0, 0, 1, 1], [], []>} : vector<32x128xbf16>, vector<128x512xbf16>, vector<32x512xf32> -> vector<32x512xf32>
    %17 = vector.extract_strided_slice %16 {offsets = [0, 0], sizes = [32, 256], strides = [1, 1]} : vector<32x512xf32> to vector<32x256xf32>
    %18 = vector.extract_strided_slice %16 {offsets = [0, 256], sizes = [32, 256], strides = [1, 1]} : vector<32x512xf32> to vector<32x256xf32>
    %19 = arith.negf %17 : vector<32x256xf32>
    %20 = math.exp %19 : vector<32x256xf32>
    %cst_8 = arith.constant 1.000000e+00 : f32
    %21 = vector.broadcast %cst_8 : f32 to vector<32x256xf32>
    %22 = arith.addf %21, %20 : vector<32x256xf32>
    %23 = arith.divf %21, %22 : vector<32x256xf32>
    %24 = arith.mulf %17, %23 : vector<32x256xf32>
    %25 = arith.mulf %24, %18 : vector<32x256xf32>
    %26 = arith.truncf %25 : vector<32x256xf32> to vector<32x256xbf16>
    %c0_9 = arith.constant 0 : index
    %c0_10 = arith.constant 0 : index
    %27 = vector.load %arg4[%c0_9, %c0_10] : memref<256x128xbf16, #tpu.memory_space<vmem>>, vector<256x128xbf16>
    %cst_11 = arith.constant dense<0.000000e+00> : vector<32x128xf32>
    %28 = tpu.matmul %26, %27, %cst_11 {dimension_numbers = #tpu.dot_dimension_numbers<[1], [0], [0], [1], [0, 0, 1, 1], [], []>} : vector<32x256xbf16>, vector<256x128xbf16>, vector<32x128xf32> -> vector<32x128xf32>
    %29 = arith.addf %0, %28 : vector<32x128xf32>
    %c0_12 = arith.constant 0 : index
    %c0_13 = arith.constant 0 : index
    %30 = vector.load %arg5[%c0_12, %c0_13] : memref<32x128xf32, #tpu.memory_space<vmem>>, vector<32x128xf32>
    tpu.vector_store %arg5[%c0_12, %c0_13], %29 {strides = array<i32>} : memref<32x128xf32, #tpu.memory_space<vmem>>, vector<32x128xf32>,
    return
  }
  func.func @transform_0(%arg0: i32) -> (i32, i32) {
    %c0_i32 = arith.constant 0 : i32
    %c0_i32_0 = arith.constant 0 : i32
    return %arg0, %c0_i32 : i32, i32
  }
  func.func @transform_1(%arg0: i32) -> (i32, i32) {
    %c0_i32 = arith.constant 0 : i32
    %c0_i32_0 = arith.constant 0 : i32
    %c0_i32_1 = arith.constant 0 : i32
    return %c0_i32, %c0_i32_0 : i32, i32
  }
  func.func @transform_2(%arg0: i32) -> (i32, i32) {
    %c0_i32 = arith.constant 0 : i32
    %c0_i32_0 = arith.constant 0 : i32
    %c0_i32_1 = arith.constant 0 : i32
    return %c0_i32, %c0_i32_0 : i32, i32
  }
  func.func @transform_3(%arg0: i32) -> (i32, i32) {
    %c0_i32 = arith.constant 0 : i32
    %c0_i32_0 = arith.constant 0 : i32
    %c0_i32_1 = arith.constant 0 : i32
    return %c0_i32, %c0_i32_0 : i32, i32
  }
  func.func @transform_4(%arg0: i32) -> (i32, i32) {
    %c0_i32 = arith.constant 0 : i32
    %c0_i32_0 = arith.constant 0 : i32
    return %arg0, %c0_i32 : i32, i32
  }
}

module attributes {stable_mosaic.version = 11 : i64} {
  func.func @_attn_block_kernel(%arg0: i32, %arg1: memref<1x16x128xf32, #tpu.memory_space<vmem>>, %arg2: memref<1x128xf32, #tpu.memory_space<vmem>>, %arg3: memref<128x384xbf16, #tpu.memory_space<vmem>>, %arg4: memref<128x128xbf16, #tpu.memory_space<vmem>>, %arg5: memref<16x32xf32, #tpu.memory_space<vmem>>, %arg6: memref<16x32xf32, #tpu.memory_space<vmem>>, %arg7: memref<1x16x128xf32, #tpu.memory_space<vmem>>) attributes {dimension_semantics = [#tpu.dimension_semantics<parallel>], iteration_bounds = array<i64: 2>, scalar_prefetch = 0 : i64, scratch_operands = 0 : i64, tpu.core_type = #tpu.core_type<tc>, window_params = [{transform_indices = @transform_0, window_bounds = array<i64: 1, 16, 128>}, {pipeline_mode = #tpu.pipeline_mode<synchronous>, transform_indices = @transform_1, window_bounds = array<i64: 1, 128>}, {pipeline_mode = #tpu.pipeline_mode<synchronous>, transform_indices = @transform_2, window_bounds = array<i64: 128, 384>}, {pipeline_mode = #tpu.pipeline_mode<synchronous>, transform_indices = @transform_3, window_bounds = array<i64: 128, 128>}, {pipeline_mode = #tpu.pipeline_mode<synchronous>, transform_indices = @transform_4, window_bounds = array<i64: 16, 32>}, {pipeline_mode = #tpu.pipeline_mode<synchronous>, transform_indices = @transform_5, window_bounds = array<i64: 16, 32>}, {transform_indices = @transform_6, window_bounds = array<i64: 1, 16, 128>}]} {
    %c0 = arith.constant 0 : index
    %c0_0 = arith.constant 0 : index
    %c0_1 = arith.constant 0 : index
    %0 = vector.load %arg1[%c0, %c0_0, %c0_1] : memref<1x16x128xf32, #tpu.memory_space<vmem>>, vector<1x16x128xf32>
    %1 = vector.shape_cast %0 : vector<1x16x128xf32> to vector<16x128xf32>
    %2 = arith.mulf %1, %1 : vector<16x128xf32>
    %cst = arith.constant dense<0.000000e+00> : vector<16xf32>
    %3 = vector.multi_reduction <add>, %2, %cst [1] : vector<16x128xf32> to vector<16xf32>
    %4 = vector.shape_cast %3 : vector<16xf32> to vector<16x1xf32>
    %cst_2 = arith.constant 1.280000e+02 : f32
    %5 = vector.broadcast %cst_2 : f32 to vector<16x1xf32>
    %6 = arith.divf %4, %5 : vector<16x1xf32>
    %cst_3 = arith.constant 9.99999997E-7 : f32
    %7 = vector.broadcast %cst_3 : f32 to vector<16x1xf32>
    %8 = arith.addf %6, %7 : vector<16x1xf32>
    %9 = math.rsqrt %8 : vector<16x1xf32>
    %10 = vector.broadcast %9 : vector<16x1xf32> to vector<16x128xf32>
    %11 = arith.mulf %1, %10 : vector<16x128xf32>
    %c0_4 = arith.constant 0 : index
    %c0_5 = arith.constant 0 : index
    %12 = vector.load %arg2[%c0_4, %c0_5] : memref<1x128xf32, #tpu.memory_space<vmem>>, vector<1x128xf32>
    %13 = vector.broadcast %12 : vector<1x128xf32> to vector<16x128xf32>
    %14 = arith.mulf %11, %13 : vector<16x128xf32>
    %15 = arith.truncf %14 : vector<16x128xf32> to vector<16x128xbf16>
    %c0_6 = arith.constant 0 : index
    %c0_7 = arith.constant 0 : index
    %16 = vector.load %arg3[%c0_6, %c0_7] : memref<128x384xbf16, #tpu.memory_space<vmem>>, vector<128x384xbf16>
    %cst_8 = arith.constant dense<0.000000e+00> : vector<16x384xf32>
    %17 = tpu.matmul %15, %16, %cst_8 {dimension_numbers = #tpu.dot_dimension_numbers<[1], [0], [0], [1], [0, 0, 1, 1], [], []>} : vector<16x128xbf16>, vector<128x384xbf16>, vector<16x384xf32> -> vector<16x384xf32>
    %c0_9 = arith.constant 0 : index
    %c0_10 = arith.constant 0 : index
    %18 = vector.load %arg5[%c0_9, %c0_10] : memref<16x32xf32, #tpu.memory_space<vmem>>, vector<16x32xf32>
    %c0_11 = arith.constant 0 : index
    %c0_12 = arith.constant 0 : index
    %19 = vector.load %arg6[%c0_11, %c0_12] : memref<16x32xf32, #tpu.memory_space<vmem>>, vector<16x32xf32>
    %20 = tpu.iota {dimensions = array<i32: 0>} : vector<16x16xi32>
    %21 = tpu.iota {dimensions = array<i32: 1>} : vector<16x16xi32>
    %22 = arith.cmpi sle, %21, %20 : vector<16x16xi32>
    %23 = vector.extract_strided_slice %17 {offsets = [0, 0], sizes = [16, 32], strides = [1, 1]} : vector<16x384xf32> to vector<16x32xf32>
    %24 = vector.extract_strided_slice %23 {offsets = [0, 0], sizes = [16, 16], strides = [1, 1]} : vector<16x32xf32> to vector<16x16xf32>
    %25 = vector.extract_strided_slice %23 {offsets = [0, 16], sizes = [16, 16], strides = [1, 1]} : vector<16x32xf32> to vector<16x16xf32>
    %cst_13 = arith.constant 0.000000e+00 : f32
    %26 = vector.broadcast %cst_13 : f32 to vector<16x16xf32>
    %27 = arith.subf %26, %25 : vector<16x16xf32>
    %28 = tpu.concatenate %27, %24 in 1 : vector<16x16xf32>, vector<16x16xf32> -> vector<16x32xf32>
    %29 = arith.mulf %23, %18 : vector<16x32xf32>
    %30 = arith.mulf %28, %19 : vector<16x32xf32>
    %31 = arith.addf %29, %30 : vector<16x32xf32>
    %cst_14 = arith.constant 0.176776692 : f32
    %32 = vector.broadcast %cst_14 : f32 to vector<16x32xf32>
    %33 = arith.mulf %31, %32 : vector<16x32xf32>
    %34 = vector.extract_strided_slice %17 {offsets = [0, 128], sizes = [16, 32], strides = [1, 1]} : vector<16x384xf32> to vector<16x32xf32>
    %35 = vector.extract_strided_slice %34 {offsets = [0, 0], sizes = [16, 16], strides = [1, 1]} : vector<16x32xf32> to vector<16x16xf32>
    %36 = vector.extract_strided_slice %34 {offsets = [0, 16], sizes = [16, 16], strides = [1, 1]} : vector<16x32xf32> to vector<16x16xf32>
    %cst_15 = arith.constant 0.000000e+00 : f32
    %37 = vector.broadcast %cst_15 : f32 to vector<16x16xf32>
    %38 = arith.subf %37, %36 : vector<16x16xf32>
    %39 = tpu.concatenate %38, %35 in 1 : vector<16x16xf32>, vector<16x16xf32> -> vector<16x32xf32>
    %40 = arith.mulf %34, %18 : vector<16x32xf32>
    %41 = arith.mulf %39, %19 : vector<16x32xf32>
    %42 = arith.addf %40, %41 : vector<16x32xf32>
    %43 = vector.extract_strided_slice %17 {offsets = [0, 256], sizes = [16, 32], strides = [1, 1]} : vector<16x384xf32> to vector<16x32xf32>
    %44 = arith.truncf %33 : vector<16x32xf32> to vector<16x32xbf16>
    %45 = arith.truncf %42 : vector<16x32xf32> to vector<16x32xbf16>
    %cst_16 = arith.constant dense<0.000000e+00> : vector<16x16xf32>
    %46 = tpu.matmul %44, %45, %cst_16 {dimension_numbers = #tpu.dot_dimension_numbers<[1], [1], [0], [0], [0, 0, 1, 0], [], []>} : vector<16x32xbf16>, vector<16x32xbf16>, vector<16x16xf32> -> vector<16x16xf32>
    %cst_17 = arith.constant -1.000000e+30 : f32
    %47 = vector.broadcast %cst_17 : f32 to vector<16x16xf32>
    %48 = arith.select %22, %46, %47 : vector<16x16xi1>, vector<16x16xf32>
    %cst_18 = arith.constant dense<0xFF800000> : vector<16xf32>
    %49 = vector.multi_reduction <maximumf>, %48, %cst_18 [1] : vector<16x16xf32> to vector<16xf32>
    %50 = vector.shape_cast %49 : vector<16xf32> to vector<16x1xf32>
    %51 = vector.broadcast %50 : vector<16x1xf32> to vector<16x16xf32>
    %52 = arith.subf %48, %51 : vector<16x16xf32>
    %53 = math.exp %52 : vector<16x16xf32>
    %cst_19 = arith.constant dense<0.000000e+00> : vector<16xf32>
    %54 = vector.multi_reduction <add>, %53, %cst_19 [1] : vector<16x16xf32> to vector<16xf32>
    %55 = vector.shape_cast %54 : vector<16xf32> to vector<16x1xf32>
    %56 = tpu.reciprocal %55 {approx = true} : vector<16x1xf32> -> vector<16x1xf32>
    %57 = vector.broadcast %56 : vector<16x1xf32> to vector<16x16xf32>
    %58 = arith.mulf %53, %57 : vector<16x16xf32>
    %59 = arith.truncf %58 : vector<16x16xf32> to vector<16x16xbf16>
    %60 = arith.truncf %43 : vector<16x32xf32> to vector<16x32xbf16>
    %cst_20 = arith.constant dense<0.000000e+00> : vector<16x32xf32>
    %61 = tpu.matmul %59, %60, %cst_20 {dimension_numbers = #tpu.dot_dimension_numbers<[1], [0], [0], [1], [0, 0, 1, 1], [], []>} : vector<16x16xbf16>, vector<16x32xbf16>, vector<16x32xf32> -> vector<16x32xf32>
    %62 = vector.extract_strided_slice %17 {offsets = [0, 32], sizes = [16, 32], strides = [1, 1]} : vector<16x384xf32> to vector<16x32xf32>
    %63 = vector.extract_strided_slice %62 {offsets = [0, 0], sizes = [16, 16], strides = [1, 1]} : vector<16x32xf32> to vector<16x16xf32>
    %64 = vector.extract_strided_slice %62 {offsets = [0, 16], sizes = [16, 16], strides = [1, 1]} : vector<16x32xf32> to vector<16x16xf32>
    %cst_21 = arith.constant 0.000000e+00 : f32
    %65 = vector.broadcast %cst_21 : f32 to vector<16x16xf32>
    %66 = arith.subf %65, %64 : vector<16x16xf32>
    %67 = tpu.concatenate %66, %63 in 1 : vector<16x16xf32>, vector<16x16xf32> -> vector<16x32xf32>
    %68 = arith.mulf %62, %18 : vector<16x32xf32>
    %69 = arith.mulf %67, %19 : vector<16x32xf32>
    %70 = arith.addf %68, %69 : vector<16x32xf32>
    %cst_22 = arith.constant 0.176776692 : f32
    %71 = vector.broadcast %cst_22 : f32 to vector<16x32xf32>
    %72 = arith.mulf %70, %71 : vector<16x32xf32>
    %73 = vector.extract_strided_slice %17 {offsets = [0, 160], sizes = [16, 32], strides = [1, 1]} : vector<16x384xf32> to vector<16x32xf32>
    %74 = vector.extract_strided_slice %73 {offsets = [0, 0], sizes = [16, 16], strides = [1, 1]} : vector<16x32xf32> to vector<16x16xf32>
    %75 = vector.extract_strided_slice %73 {offsets = [0, 16], sizes = [16, 16], strides = [1, 1]} : vector<16x32xf32> to vector<16x16xf32>
    %cst_23 = arith.constant 0.000000e+00 : f32
    %76 = vector.broadcast %cst_23 : f32 to vector<16x16xf32>
    %77 = arith.subf %76, %75 : vector<16x16xf32>
    %78 = tpu.concatenate %77, %74 in 1 : vector<16x16xf32>, vector<16x16xf32> -> vector<16x32xf32>
    %79 = arith.mulf %73, %18 : vector<16x32xf32>
    %80 = arith.mulf %78, %19 : vector<16x32xf32>
    %81 = arith.addf %79, %80 : vector<16x32xf32>
    %82 = vector.extract_strided_slice %17 {offsets = [0, 288], sizes = [16, 32], strides = [1, 1]} : vector<16x384xf32> to vector<16x32xf32>
    %83 = arith.truncf %72 : vector<16x32xf32> to vector<16x32xbf16>
    %84 = arith.truncf %81 : vector<16x32xf32> to vector<16x32xbf16>
    %cst_24 = arith.constant dense<0.000000e+00> : vector<16x16xf32>
    %85 = tpu.matmul %83, %84, %cst_24 {dimension_numbers = #tpu.dot_dimension_numbers<[1], [1], [0], [0], [0, 0, 1, 0], [], []>} : vector<16x32xbf16>, vector<16x32xbf16>, vector<16x16xf32> -> vector<16x16xf32>
    %cst_25 = arith.constant -1.000000e+30 : f32
    %86 = vector.broadcast %cst_25 : f32 to vector<16x16xf32>
    %87 = arith.select %22, %85, %86 : vector<16x16xi1>, vector<16x16xf32>
    %cst_26 = arith.constant dense<0xFF800000> : vector<16xf32>
    %88 = vector.multi_reduction <maximumf>, %87, %cst_26 [1] : vector<16x16xf32> to vector<16xf32>
    %89 = vector.shape_cast %88 : vector<16xf32> to vector<16x1xf32>
    %90 = vector.broadcast %89 : vector<16x1xf32> to vector<16x16xf32>
    %91 = arith.subf %87, %90 : vector<16x16xf32>
    %92 = math.exp %91 : vector<16x16xf32>
    %cst_27 = arith.constant dense<0.000000e+00> : vector<16xf32>
    %93 = vector.multi_reduction <add>, %92, %cst_27 [1] : vector<16x16xf32> to vector<16xf32>
    %94 = vector.shape_cast %93 : vector<16xf32> to vector<16x1xf32>
    %95 = tpu.reciprocal %94 {approx = true} : vector<16x1xf32> -> vector<16x1xf32>
    %96 = vector.broadcast %95 : vector<16x1xf32> to vector<16x16xf32>
    %97 = arith.mulf %92, %96 : vector<16x16xf32>
    %98 = arith.truncf %97 : vector<16x16xf32> to vector<16x16xbf16>
    %99 = arith.truncf %82 : vector<16x32xf32> to vector<16x32xbf16>
    %cst_28 = arith.constant dense<0.000000e+00> : vector<16x32xf32>
    %100 = tpu.matmul %98, %99, %cst_28 {dimension_numbers = #tpu.dot_dimension_numbers<[1], [0], [0], [1], [0, 0, 1, 1], [], []>} : vector<16x16xbf16>, vector<16x32xbf16>, vector<16x32xf32> -> vector<16x32xf32>
    %101 = vector.extract_strided_slice %17 {offsets = [0, 64], sizes = [16, 32], strides = [1, 1]} : vector<16x384xf32> to vector<16x32xf32>
    %102 = vector.extract_strided_slice %101 {offsets = [0, 0], sizes = [16, 16], strides = [1, 1]} : vector<16x32xf32> to vector<16x16xf32>
    %103 = vector.extract_strided_slice %101 {offsets = [0, 16], sizes = [16, 16], strides = [1, 1]} : vector<16x32xf32> to vector<16x16xf32>
    %cst_29 = arith.constant 0.000000e+00 : f32
    %104 = vector.broadcast %cst_29 : f32 to vector<16x16xf32>
    %105 = arith.subf %104, %103 : vector<16x16xf32>
    %106 = tpu.concatenate %105, %102 in 1 : vector<16x16xf32>, vector<16x16xf32> -> vector<16x32xf32>
    %107 = arith.mulf %101, %18 : vector<16x32xf32>
    %108 = arith.mulf %106, %19 : vector<16x32xf32>
    %109 = arith.addf %107, %108 : vector<16x32xf32>
    %cst_30 = arith.constant 0.176776692 : f32
    %110 = vector.broadcast %cst_30 : f32 to vector<16x32xf32>
    %111 = arith.mulf %109, %110 : vector<16x32xf32>
    %112 = vector.extract_strided_slice %17 {offsets = [0, 192], sizes = [16, 32], strides = [1, 1]} : vector<16x384xf32> to vector<16x32xf32>
    %113 = vector.extract_strided_slice %112 {offsets = [0, 0], sizes = [16, 16], strides = [1, 1]} : vector<16x32xf32> to vector<16x16xf32>
    %114 = vector.extract_strided_slice %112 {offsets = [0, 16], sizes = [16, 16], strides = [1, 1]} : vector<16x32xf32> to vector<16x16xf32>
    %cst_31 = arith.constant 0.000000e+00 : f32
    %115 = vector.broadcast %cst_31 : f32 to vector<16x16xf32>
    %116 = arith.subf %115, %114 : vector<16x16xf32>
    %117 = tpu.concatenate %116, %113 in 1 : vector<16x16xf32>, vector<16x16xf32> -> vector<16x32xf32>
    %118 = arith.mulf %112, %18 : vector<16x32xf32>
    %119 = arith.mulf %117, %19 : vector<16x32xf32>
    %120 = arith.addf %118, %119 : vector<16x32xf32>
    %121 = vector.extract_strided_slice %17 {offsets = [0, 320], sizes = [16, 32], strides = [1, 1]} : vector<16x384xf32> to vector<16x32xf32>
    %122 = arith.truncf %111 : vector<16x32xf32> to vector<16x32xbf16>
    %123 = arith.truncf %120 : vector<16x32xf32> to vector<16x32xbf16>
    %cst_32 = arith.constant dense<0.000000e+00> : vector<16x16xf32>
    %124 = tpu.matmul %122, %123, %cst_32 {dimension_numbers = #tpu.dot_dimension_numbers<[1], [1], [0], [0], [0, 0, 1, 0], [], []>} : vector<16x32xbf16>, vector<16x32xbf16>, vector<16x16xf32> -> vector<16x16xf32>
    %cst_33 = arith.constant -1.000000e+30 : f32
    %125 = vector.broadcast %cst_33 : f32 to vector<16x16xf32>
    %126 = arith.select %22, %124, %125 : vector<16x16xi1>, vector<16x16xf32>
    %cst_34 = arith.constant dense<0xFF800000> : vector<16xf32>
    %127 = vector.multi_reduction <maximumf>, %126, %cst_34 [1] : vector<16x16xf32> to vector<16xf32>
    %128 = vector.shape_cast %127 : vector<16xf32> to vector<16x1xf32>
    %129 = vector.broadcast %128 : vector<16x1xf32> to vector<16x16xf32>
    %130 = arith.subf %126, %129 : vector<16x16xf32>
    %131 = math.exp %130 : vector<16x16xf32>
    %cst_35 = arith.constant dense<0.000000e+00> : vector<16xf32>
    %132 = vector.multi_reduction <add>, %131, %cst_35 [1] : vector<16x16xf32> to vector<16xf32>
    %133 = vector.shape_cast %132 : vector<16xf32> to vector<16x1xf32>
    %134 = tpu.reciprocal %133 {approx = true} : vector<16x1xf32> -> vector<16x1xf32>
    %135 = vector.broadcast %134 : vector<16x1xf32> to vector<16x16xf32>
    %136 = arith.mulf %131, %135 : vector<16x16xf32>
    %137 = arith.truncf %136 : vector<16x16xf32> to vector<16x16xbf16>
    %138 = arith.truncf %121 : vector<16x32xf32> to vector<16x32xbf16>
    %cst_36 = arith.constant dense<0.000000e+00> : vector<16x32xf32>
    %139 = tpu.matmul %137, %138, %cst_36 {dimension_numbers = #tpu.dot_dimension_numbers<[1], [0], [0], [1], [0, 0, 1, 1], [], []>} : vector<16x16xbf16>, vector<16x32xbf16>, vector<16x32xf32> -> vector<16x32xf32>
    %140 = vector.extract_strided_slice %17 {offsets = [0, 96], sizes = [16, 32], strides = [1, 1]} : vector<16x384xf32> to vector<16x32xf32>
    %141 = vector.extract_strided_slice %140 {offsets = [0, 0], sizes = [16, 16], strides = [1, 1]} : vector<16x32xf32> to vector<16x16xf32>
    %142 = vector.extract_strided_slice %140 {offsets = [0, 16], sizes = [16, 16], strides = [1, 1]} : vector<16x32xf32> to vector<16x16xf32>
    %cst_37 = arith.constant 0.000000e+00 : f32
    %143 = vector.broadcast %cst_37 : f32 to vector<16x16xf32>
    %144 = arith.subf %143, %142 : vector<16x16xf32>
    %145 = tpu.concatenate %144, %141 in 1 : vector<16x16xf32>, vector<16x16xf32> -> vector<16x32xf32>
    %146 = arith.mulf %140, %18 : vector<16x32xf32>
    %147 = arith.mulf %145, %19 : vector<16x32xf32>
    %148 = arith.addf %146, %147 : vector<16x32xf32>
    %cst_38 = arith.constant 0.176776692 : f32
    %149 = vector.broadcast %cst_38 : f32 to vector<16x32xf32>
    %150 = arith.mulf %148, %149 : vector<16x32xf32>
    %151 = vector.extract_strided_slice %17 {offsets = [0, 224], sizes = [16, 32], strides = [1, 1]} : vector<16x384xf32> to vector<16x32xf32>
    %152 = vector.extract_strided_slice %151 {offsets = [0, 0], sizes = [16, 16], strides = [1, 1]} : vector<16x32xf32> to vector<16x16xf32>
    %153 = vector.extract_strided_slice %151 {offsets = [0, 16], sizes = [16, 16], strides = [1, 1]} : vector<16x32xf32> to vector<16x16xf32>
    %cst_39 = arith.constant 0.000000e+00 : f32
    %154 = vector.broadcast %cst_39 : f32 to vector<16x16xf32>
    %155 = arith.subf %154, %153 : vector<16x16xf32>
    %156 = tpu.concatenate %155, %152 in 1 : vector<16x16xf32>, vector<16x16xf32> -> vector<16x32xf32>
    %157 = arith.mulf %151, %18 : vector<16x32xf32>
    %158 = arith.mulf %156, %19 : vector<16x32xf32>
    %159 = arith.addf %157, %158 : vector<16x32xf32>
    %160 = vector.extract_strided_slice %17 {offsets = [0, 352], sizes = [16, 32], strides = [1, 1]} : vector<16x384xf32> to vector<16x32xf32>
    %161 = arith.truncf %150 : vector<16x32xf32> to vector<16x32xbf16>
    %162 = arith.truncf %159 : vector<16x32xf32> to vector<16x32xbf16>
    %cst_40 = arith.constant dense<0.000000e+00> : vector<16x16xf32>
    %163 = tpu.matmul %161, %162, %cst_40 {dimension_numbers = #tpu.dot_dimension_numbers<[1], [1], [0], [0], [0, 0, 1, 0], [], []>} : vector<16x32xbf16>, vector<16x32xbf16>, vector<16x16xf32> -> vector<16x16xf32>
    %cst_41 = arith.constant -1.000000e+30 : f32
    %164 = vector.broadcast %cst_41 : f32 to vector<16x16xf32>
    %165 = arith.select %22, %163, %164 : vector<16x16xi1>, vector<16x16xf32>
    %cst_42 = arith.constant dense<0xFF800000> : vector<16xf32>
    %166 = vector.multi_reduction <maximumf>, %165, %cst_42 [1] : vector<16x16xf32> to vector<16xf32>
    %167 = vector.shape_cast %166 : vector<16xf32> to vector<16x1xf32>
    %168 = vector.broadcast %167 : vector<16x1xf32> to vector<16x16xf32>
    %169 = arith.subf %165, %168 : vector<16x16xf32>
    %170 = math.exp %169 : vector<16x16xf32>
    %cst_43 = arith.constant dense<0.000000e+00> : vector<16xf32>
    %171 = vector.multi_reduction <add>, %170, %cst_43 [1] : vector<16x16xf32> to vector<16xf32>
    %172 = vector.shape_cast %171 : vector<16xf32> to vector<16x1xf32>
    %173 = tpu.reciprocal %172 {approx = true} : vector<16x1xf32> -> vector<16x1xf32>
    %174 = vector.broadcast %173 : vector<16x1xf32> to vector<16x16xf32>
    %175 = arith.mulf %170, %174 : vector<16x16xf32>
    %176 = arith.truncf %175 : vector<16x16xf32> to vector<16x16xbf16>
    %177 = arith.truncf %160 : vector<16x32xf32> to vector<16x32xbf16>
    %cst_44 = arith.constant dense<0.000000e+00> : vector<16x32xf32>
    %178 = tpu.matmul %176, %177, %cst_44 {dimension_numbers = #tpu.dot_dimension_numbers<[1], [0], [0], [1], [0, 0, 1, 1], [], []>} : vector<16x16xbf16>, vector<16x32xbf16>, vector<16x32xf32> -> vector<16x32xf32>
    %179 = tpu.concatenate %61, %100, %139, %178 in 1 : vector<16x32xf32>, vector<16x32xf32>, vector<16x32xf32>, vector<16x32xf32> -> vector<16x128xf32>
    %180 = arith.truncf %179 : vector<16x128xf32> to vector<16x128xbf16>
    %c0_45 = arith.constant 0 : index
    %c0_46 = arith.constant 0 : index
    %181 = vector.load %arg4[%c0_45, %c0_46] : memref<128x128xbf16, #tpu.memory_space<vmem>>, vector<128x128xbf16>
    %cst_47 = arith.constant dense<0.000000e+00> : vector<16x128xf32>
    %182 = tpu.matmul %180, %181, %cst_47 {dimension_numbers = #tpu.dot_dimension_numbers<[1], [0], [0], [1], [0, 0, 1, 1], [], []>} : vector<16x128xbf16>, vector<128x128xbf16>, vector<16x128xf32> -> vector<16x128xf32>
    %183 = arith.addf %1, %182 : vector<16x128xf32>
    %c0_48 = arith.constant 0 : index
    %c0_49 = arith.constant 0 : index
    %c0_50 = arith.constant 0 : index
    %184 = vector.load %arg7[%c0_48, %c0_49, %c0_50] : memref<1x16x128xf32, #tpu.memory_space<vmem>>, vector<1x16x128xf32>
    %185 = vector.shape_cast %184 : vector<1x16x128xf32> to vector<16x128xf32>
    %186 = vector.shape_cast %183 : vector<16x128xf32> to vector<1x16x128xf32>
    tpu.vector_store %arg7[%c0_48, %c0_49, %c0_50], %186 {strides = array<i32>} : memref<1x16x128xf32, #tpu.memory_space<vmem>>, vector<1x16x128xf32>,
    return
  }
  func.func @transform_0(%arg0: i32) -> (i32, i32, i32) {
    %c0_i32 = arith.constant 0 : i32
    %c0_i32_0 = arith.constant 0 : i32
    %c0_i32_1 = arith.constant 0 : i32
    return %arg0, %c0_i32, %c0_i32_0 : i32, i32, i32
  }
  func.func @transform_1(%arg0: i32) -> (i32, i32) {
    %c0_i32 = arith.constant 0 : i32
    %c0_i32_0 = arith.constant 0 : i32
    %c0_i32_1 = arith.constant 0 : i32
    return %c0_i32, %c0_i32_0 : i32, i32
  }
  func.func @transform_2(%arg0: i32) -> (i32, i32) {
    %c0_i32 = arith.constant 0 : i32
    %c0_i32_0 = arith.constant 0 : i32
    %c0_i32_1 = arith.constant 0 : i32
    return %c0_i32, %c0_i32_0 : i32, i32
  }
  func.func @transform_3(%arg0: i32) -> (i32, i32) {
    %c0_i32 = arith.constant 0 : i32
    %c0_i32_0 = arith.constant 0 : i32
    %c0_i32_1 = arith.constant 0 : i32
    return %c0_i32, %c0_i32_0 : i32, i32
  }
  func.func @transform_4(%arg0: i32) -> (i32, i32) {
    %c0_i32 = arith.constant 0 : i32
    %c0_i32_0 = arith.constant 0 : i32
    %c0_i32_1 = arith.constant 0 : i32
    return %c0_i32, %c0_i32_0 : i32, i32
  }
  func.func @transform_5(%arg0: i32) -> (i32, i32) {
    %c0_i32 = arith.constant 0 : i32
    %c0_i32_0 = arith.constant 0 : i32
    %c0_i32_1 = arith.constant 0 : i32
    return %c0_i32, %c0_i32_0 : i32, i32
  }
  func.func @transform_6(%arg0: i32) -> (i32, i32, i32) {
    %c0_i32 = arith.constant 0 : i32
    %c0_i32_0 = arith.constant 0 : i32
    %c0_i32_1 = arith.constant 0 : i32
    return %arg0, %c0_i32, %c0_i32_0 : i32, i32, i32
  }
}

module attributes {stable_mosaic.version = 11 : i64} {
  func.func @_final_head_kernel(%arg0: i32, %arg1: memref<32x128xf32, #tpu.memory_space<vmem>>, %arg2: memref<1x128xf32, #tpu.memory_space<vmem>>, %arg3: memref<128x256xbf16, #tpu.memory_space<vmem>>, %arg4: memref<32x256xf32, #tpu.memory_space<vmem>>) attributes {dimension_semantics = [#tpu.dimension_semantics<parallel>], iteration_bounds = array<i64: 1>, scalar_prefetch = 0 : i64, scratch_operands = 0 : i64, tpu.core_type = #tpu.core_type<tc>, window_params = [{transform_indices = @transform_0, window_bounds = array<i64: 32, 128>}, {pipeline_mode = #tpu.pipeline_mode<synchronous>, transform_indices = @transform_1, window_bounds = array<i64: 1, 128>}, {pipeline_mode = #tpu.pipeline_mode<synchronous>, transform_indices = @transform_2, window_bounds = array<i64: 128, 256>}, {transform_indices = @transform_3, window_bounds = array<i64: 32, 256>}]} {
    %c0 = arith.constant 0 : index
    %c0_0 = arith.constant 0 : index
    %0 = vector.load %arg1[%c0, %c0_0] : memref<32x128xf32, #tpu.memory_space<vmem>>, vector<32x128xf32>
    %1 = arith.mulf %0, %0 : vector<32x128xf32>
    %cst = arith.constant dense<0.000000e+00> : vector<32xf32>
    %2 = vector.multi_reduction <add>, %1, %cst [1] : vector<32x128xf32> to vector<32xf32>
    %3 = vector.shape_cast %2 : vector<32xf32> to vector<32x1xf32>
    %cst_1 = arith.constant 1.280000e+02 : f32
    %4 = vector.broadcast %cst_1 : f32 to vector<32x1xf32>
    %5 = arith.divf %3, %4 : vector<32x1xf32>
    %cst_2 = arith.constant 9.99999997E-7 : f32
    %6 = vector.broadcast %cst_2 : f32 to vector<32x1xf32>
    %7 = arith.addf %5, %6 : vector<32x1xf32>
    %8 = math.rsqrt %7 : vector<32x1xf32>
    %9 = vector.broadcast %8 : vector<32x1xf32> to vector<32x128xf32>
    %10 = arith.mulf %0, %9 : vector<32x128xf32>
    %c0_3 = arith.constant 0 : index
    %c0_4 = arith.constant 0 : index
    %11 = vector.load %arg2[%c0_3, %c0_4] : memref<1x128xf32, #tpu.memory_space<vmem>>, vector<1x128xf32>
    %12 = vector.broadcast %11 : vector<1x128xf32> to vector<32x128xf32>
    %13 = arith.mulf %10, %12 : vector<32x128xf32>
    %14 = arith.truncf %13 : vector<32x128xf32> to vector<32x128xbf16>
    %c0_5 = arith.constant 0 : index
    %c0_6 = arith.constant 0 : index
    %15 = vector.load %arg3[%c0_5, %c0_6] : memref<128x256xbf16, #tpu.memory_space<vmem>>, vector<128x256xbf16>
    %cst_7 = arith.constant dense<0.000000e+00> : vector<32x256xf32>
    %16 = tpu.matmul %14, %15, %cst_7 {dimension_numbers = #tpu.dot_dimension_numbers<[1], [0], [0], [1], [0, 0, 1, 1], [], []>} : vector<32x128xbf16>, vector<128x256xbf16>, vector<32x256xf32> -> vector<32x256xf32>
    %c0_8 = arith.constant 0 : index
    %c0_9 = arith.constant 0 : index
    %17 = vector.load %arg4[%c0_8, %c0_9] : memref<32x256xf32, #tpu.memory_space<vmem>>, vector<32x256xf32>
    tpu.vector_store %arg4[%c0_8, %c0_9], %16 {strides = array<i32>} : memref<32x256xf32, #tpu.memory_space<vmem>>, vector<32x256xf32>,
    return
  }
  func.func @transform_0(%arg0: i32) -> (i32, i32) {
    %c0_i32 = arith.constant 0 : i32
    %c0_i32_0 = arith.constant 0 : i32
    return %arg0, %c0_i32 : i32, i32
  }
  func.func @transform_1(%arg0: i32) -> (i32, i32) {
    %c0_i32 = arith.constant 0 : i32
    %c0_i32_0 = arith.constant 0 : i32
    %c0_i32_1 = arith.constant 0 : i32
    return %c0_i32, %c0_i32_0 : i32, i32
  }
  func.func @transform_2(%arg0: i32) -> (i32, i32) {
    %c0_i32 = arith.constant 0 : i32
    %c0_i32_0 = arith.constant 0 : i32
    %c0_i32_1 = arith.constant 0 : i32
    return %c0_i32, %c0_i32_0 : i32, i32
  }
  func.func @transform_3(%arg0: i32) -> (i32, i32) {
    %c0_i32 = arith.constant 0 : i32
    %c0_i32_0 = arith.constant 0 : i32
    return %arg0, %c0_i32 : i32, i32
  }
}

</mosaic_0001>

<bundles_post_ra>
// kernel: decoder_forward.9
= control target key start
LH: loop header
LB: loop body
LE: loop exit
PB: predicated region body
PF: predicated region fallthrough
CT: control target
= control target key end

     0   :  { %s447_s0 = inlined_call_operand.vmem [shape: f32[32,128], index: 0, kind: input, shape index: {}]   ;;  %s448_s1 = inlined_call_operand.vmem [shape: f32[1,128], index: 1, kind: input, shape index: {}]   ;;  %s449_s2 = inlined_call_operand.vmem [shape: bf16[128,256], index: 2, kind: input, shape index: {}]   ;;  %s450_s3 = inlined_call_operand.hbm [shape: f32[32,256], index: 3, kind: output, shape index: {}]  }
   0x1   :  { %v355_v0 = vld [vmem:[%s447_s0 + $0x10] sm:$0xff]  ;;  %v360_v1 = vld [vmem:[%s447_s0] sm:$0xff]  ;;  %v365_v2 = vld [vmem:[%s447_s0 + $0x18] sm:$0xff] }
   0x2   :  { %v22_v3 = vmul.f32 %v355_v0, %v355_v0  ;;  %v20_v4 = vmul.f32 %v360_v1, %v360_v1  ;;  %v374_v5 = vld [vmem:[%s447_s0 + $0x8] sm:$0xff]  ;;  %v23_v8 = vmul.f32 %v365_v2, %v365_v2  ;;  %v275_v10 = vld [vmem:[%s449_s2 + $0x14] ss:$8 sps:$4 sm:$0xff]   ;;  %v277_v11 = vld [vmem:[%s449_s2 + $0x10] ss:$8 sps:$4 sm:$0xff]  }
   0x3   :  { %v272_v6 = vld [vmem:[%s449_s2 + $0x4] ss:$8 sps:$4 sm:$0xff]   ;;  %v274_v7 = vld [vmem:[%s449_s2] ss:$8 sps:$4 sm:$0xff]   ;;  %v21_v9 = vmul.f32 %v374_v5, %v374_v5 }
   0x4   :  { %28 = vadd.xlane.f32.xlu1 %v22_v3  ;;  %24 = vadd.xlane.f32.xlu0 %v20_v4 }
   0x5   :  { %158 = vmatprep.subr.bf16.mxu0 %v272_v6  ;;  %252 = vmatprep.subr.bf16.mxu1 %v272_v6 }
   0x6   :  { %159 = vmatpush1.bf16.msra.mxu0 %v274_v7  ;;  %260 = vmatpush1.bf16.msra.mxu1 %v274_v7 }
   0x7   :  { %160 = vmatprep.subr.bf16.mxu0 %v275_v10  ;;  %253 = vmatprep.subr.bf16.mxu1 %v275_v10 }
   0x8   :  { %30 = vadd.xlane.f32.xlu1 %v23_v8  ;;  %26 = vadd.xlane.f32.xlu0 %v21_v9 }
   0x9   :  { %8 = vsyncpa [#allocation3], 0  ;;  %v278_v12 = vld [vmem:[%s449_s2 + $0x24] ss:$8 sps:$4 sm:$0xff]   ;;  %v280_v13 = vld [vmem:[%s449_s2 + $0x20] ss:$8 sps:$4 sm:$0xff]  }
   0xa   :  { %161 = vmatpush1.bf16.msra.mxu0 %v277_v11  ;;  %261 = vmatpush1.bf16.msra.mxu1 %v277_v11  ;;  %v281_v14 = vld [vmem:[%s449_s2 + $0x34] ss:$8 sps:$4 sm:$0xff]   ;;  %v283_v15 = vld [vmem:[%s449_s2 + $0x30] ss:$8 sps:$4 sm:$0xff]   ;;  %v284_v16 = vld [vmem:[%s449_s2 + $0x44] ss:$8 sps:$4 sm:$0xff]  }
   0xb   :  { %162 = vmatprep.subr.bf16.mxu0 %v278_v12  ;;  %254 = vmatprep.subr.bf16.mxu1 %v278_v12  ;;  %v286_v17 = vld [vmem:[%s449_s2 + $0x40] ss:$8 sps:$4 sm:$0xff]   ;;  %v287_v18 = vld [vmem:[%s449_s2 + $0x54] ss:$8 sps:$4 sm:$0xff]   ;;  %v289_v19 = vld [vmem:[%s449_s2 + $0x50] ss:$8 sps:$4 sm:$0xff]  }
   0xc   :  { %v290_v20 = vld [vmem:[%s449_s2 + $0x64] ss:$8 sps:$4 sm:$0xff]   ;;  %v328_v21 = vmov 0   ;;  %v292_v22 = vld [vmem:[%s449_s2 + $0x60] ss:$8 sps:$4 sm:$0xff]   ;;  %s329_s25 = smov [#allocation2]  }
   0xd   :  { %190 = vmatprep.mubr.bf16.mxu0 %v328_v21  ;;  %200 = vmatprep.mubr.bf16.mxu1 %v328_v21  ;;  %v293_v23 = vld [vmem:[%s449_s2 + $0x74] ss:$8 sps:$4 sm:$0xff]   ;;  %v295_v24 = vld [vmem:[%s449_s2 + $0x70] ss:$8 sps:$4 sm:$0xff]   ;;  %v235_v42 = vld [vmem:[%s448_s1] ss:$0 sm:$0xff] }
   0xe   :  { %163 = vmatpush1.bf16.msra.mxu0 %v280_v13  ;;  %262 = vmatpush1.bf16.msra.mxu1 %v280_v13  ;;  %s224_s0 = sshll.u32 %s329_s25, 4  ;;  %s225_s0 = int_to_ptr.vmem [resolvable:$true] %s224_s0 }
   0xf   :  { %164 = vmatprep.subr.bf16.mxu0 %v281_v14  ;;  %255 = vmatprep.subr.bf16.mxu1 %v281_v14  ;;  %s304_s1 = scalar_lea.vmem %s225_s0, 1024  ;;  %p309_p1 = scmp.lt.s32.totalorder %s225_s0, %s225_s0 }
  0x10   :  { %p305_p0 = scmp.ne.s32.totalorder %s225_s0, %s304_s1  ;;  %p310_p2 = scmp.lt.s32.totalorder %s304_s1, %s304_s1 }
  0x12   :  { %165 = vmatpush1.bf16.msra.mxu0 %v283_v15  ;;  %263 = vmatpush1.bf16.msra.mxu1 %v283_v15  ;;  %p311_p3 = por %p310_p2, %p309_p1 }
  0x13   :  { %166 = vmatprep.subr.bf16.mxu0 %v284_v16  ;;  %256 = vmatprep.subr.bf16.mxu1 %v284_v16 }
  0x14   :  { %p312_p4 = pnand %p311_p3, %p305_p0 }
  0x16   :  { %167 = vmatpush1.bf16.msra.mxu0 %v286_v17  ;;  %264 = vmatpush1.bf16.msra.mxu1 %v286_v17 }
  0x17   :  { %168 = vmatprep.subr.bf16.mxu0 %v287_v18  ;;  %257 = vmatprep.subr.bf16.mxu1 %v287_v18 }
  0x1a   :  { %169 = vmatpush1.bf16.msra.mxu0 %v289_v19  ;;  %265 = vmatpush1.bf16.msra.mxu1 %v289_v19 }
  0x1b   :  { %170 = vmatprep.subr.bf16.mxu0 %v290_v20  ;;  %258 = vmatprep.subr.bf16.mxu1 %v290_v20 }
  0x1e   :  { %171 = vmatpush1.bf16.msra.mxu0 %v292_v22  ;;  %266 = vmatpush1.bf16.msra.mxu1 %v292_v22 }
  0x1f   :  { %172 = vmatprep.subr.bf16.mxu0 %v293_v23  ;;  %259 = vmatprep.subr.bf16.mxu1 %v293_v23 }
  0x22   :  { %173 = vmatpush1.bf16.msra.mxu0 %v295_v24  ;;  %267 = vmatpush1.bf16.msra.mxu1 %v295_v24 }
  0x91   :  { %v29_v25 = vpop.xlane.xlu1 %28  ;;  %v25_v26 = vpop.xlane.xlu0 %24 }
  0x92   :  { %v35_v27 = vmul.f32 0.0078125, %v29_v25  ;;  %v33_v28 = vmul.f32 0.0078125, %v25_v26 }
  0x94   :  { %v39_v29 = vadd.f32 1e-06, %v35_v27  ;;  %v37_v30 = vadd.f32 1e-06, %v33_v28 }
  0x95   :  { %v31_v31 = vpop.xlane.xlu1 %30  ;;  %v27_v32 = vpop.xlane.xlu0 %26 }
  0x96   :  { %296 = vrsqrt.f32 %v39_v29  ;;  %v36_v33 = vmul.f32 0.0078125, %v31_v31  ;;  %v34_v34 = vmul.f32 0.0078125, %v27_v32 }
  0x97   :  { %298 = vrsqrt.f32 %v37_v30 }
  0x98   :  { %v40_v35 = vadd.f32 1e-06, %v36_v33  ;;  %v38_v36 = vadd.f32 1e-06, %v34_v34 }
  0x9a   :  { %300 = vrsqrt.f32 %v40_v35 }
  0x9b   :  { %302 = vrsqrt.f32 %v38_v36 }
  0xa0   :  { %v297_v37 = vpop.eup %296 }
  0xa1   :  { %v299_v38 = vpop.eup %298  ;;  %v47_v39 = vmul.f32 %v297_v37, %v355_v0 }
  0xa2   :  { %v45_v41 = vmul.f32 %v299_v38, %v360_v1 }
  0xa3   :  { %v58_v46 = vmul.f32 %v235_v42, %v47_v39 }
  0xa4   :  { %v301_v40 = vpop.eup %300  ;;  %v56_v48 = vmul.f32 %v235_v42, %v45_v41 }
  0xa5   :  { %v303_v43 = vpop.eup %302  ;;  %v48_v44 = vmul.f32 %v301_v40, %v365_v2 }
  0xa6   :  { %v46_v45 = vmul.f32 %v303_v43, %v374_v5 }
  0xa7   :  { %v59_v47 = vmul.f32 %v235_v42, %v48_v44 }
  0xa8   :  { %v57_v49 = vmul.f32 %v235_v42, %v46_v45 }
  0xa9   :  { %v61_v50 = vpack.c.bf16 %v59_v47, %v58_v46 }
  0xaa   :  { %v60_v51 = vpack.c.bf16 %v57_v49, %v56_v48 }
  0xab   :  { %201 = vmatmul.mubr.bf16.vlgmr.msra.gmra.mrb[0].mxu1 %v61_v50 }
  0xac   :  { %191 = vmatmul.mubr.bf16.vlgmr.msra.gmra.mrb[0].mxu0 %v60_v51 }
 0x17e   :  { %v202_v52 = vpop.f32.mrb[0].mxu1 }
 0x17f   :  { %v192_v53 = vpop.f32.mrb[0].mxu0  ;;  %215 = vst [vmem:[#allocation2 + $0x20] sm:$0xff] %v202_v52  ;;  %v204_v54 = vpop.f32.mrb[1].mxu1 }
 0x180   :  { %211 = vst [vmem:[#allocation2] sm:$0xff] %v192_v53  ;;  %v194_v55 = vpop.f32.mrb[1].mxu0  ;;  %216 = vst [vmem:[#allocation2 + $0x28] sm:$0xff] %v204_v54  ;;  %v206_v56 = vpop.f32.mrb[2].mxu1 }
 0x181   :  { %212 = vst [vmem:[#allocation2 + $0x8] sm:$0xff] %v194_v55  ;;  %v196_v57 = vpop.f32.mrb[2].mxu0  ;;  %217 = vst [vmem:[#allocation2 + $0x30] sm:$0xff] %v206_v56  ;;  %v208_v58 = vpop.f32.mrb[3].mxu1 }
 0x182   :  { %213 = vst [vmem:[#allocation2 + $0x10] sm:$0xff] %v196_v57  ;;  %v198_v59 = vpop.f32.mrb[3].mxu0  ;;  %218 = vst [vmem:[#allocation2 + $0x38] sm:$0xff] %v208_v58 }
 0x183   :  { %214 = vst [vmem:[#allocation2 + $0x18] sm:$0xff] %v198_v59 }
 0x184   :  { %315 = shalt.err (!%p312_p4)
}
 0x185   :  { %s316_s28 = scalar_lea.hbm %s450_s3, 1024 }
 0x186   :  { %p317_p5 = scmp.ne.s32.totalorder %s450_s3, %s316_s28  ;;  %p320_p6 = scmp.lt.u32.totalorder %s316_s28, %s450_s3 }
 0x188   :  { %p322_p7 = pnand %p320_p6, %p317_p5 }
 0x18a   :  { %325 = shalt.err (!%p322_p7)
}
 0x18b   :  { %s330_s6 = smov 256   ;;  %s331_s7 = smov 16  }
 0x18c   :  { %230 = dma.vmem_to_hbm [thread:$0]  %s225_s0, 1024, %s450_s3, [#allocation3], %s330_s6, %s330_s6, %s331_s7  }
 0x18d   :  { %326 = dma.done.wait [#allocation3], 1024  }
 0x18e   :  { %327 = vsyncadd [#allocation3], 4294966272 }
 0x18f   :  { %234 = vsyncpa [#allocation3], 1 }

// kernel: decoder_forward.6
= control target key start
LH: loop header
LB: loop body
LE: loop exit
PB: predicated region body
PF: predicated region fallthrough
CT: control target
= control target key end

     0   :  { %v825_v38 = vmov 0   ;;  %s1046_s0 = inlined_call_operand.vmem [shape: f32[32,128], index: 0, kind: input, shape index: {}]   ;;  %s1047_s2 = inlined_call_operand.vmem [shape: bf16[128,512], index: 2, kind: input, shape index: {}]   ;;  %s1048_s1 = inlined_call_operand.vmem [shape: f32[1,128], index: 1, kind: input, shape index: {}]   ;;  %s1049_s3 = inlined_call_operand.vmem [shape: bf16[256,128], index: 3, kind: input, shape index: {}]   ;;  %s1050_s4 = inlined_call_operand.vmem [shape: f32[32,128], index: 4, kind: output, shape index: {}]  }
   0x1   :  { %v854_v0 = vld [vmem:[%s1046_s0] sm:$0xff]  ;;  %v859_v1 = vld [vmem:[%s1046_s0 + $0x10] sm:$0xff]  ;;  %v864_v2 = vld [vmem:[%s1046_s0 + $0x8] sm:$0xff]  ;;  %288 = vmatprep.mubr.bf16.mxu0 %v825_v38  ;;  %341 = vmatprep.mubr.bf16.mxu1 %v825_v38 }
   0x2   :  { %v22_v3 = vmul.f32 %v854_v0, %v854_v0  ;;  %v24_v4 = vmul.f32 %v859_v1, %v859_v1  ;;  %v873_v5 = vld [vmem:[%s1046_s0 + $0x18] sm:$0xff]  ;;  %v721_v6 = vld [vmem:[%s1047_s2 + $0x4] ss:$16 sps:$4 sm:$0xff]   ;;  %v23_v7 = vmul.f32 %v864_v2, %v864_v2  ;;  %v725_v10 = vld [vmem:[%s1047_s2] ss:$16 sps:$4 sm:$0xff]  }
   0x3   :  { %v25_v8 = vmul.f32 %v873_v5, %v873_v5  ;;  %v723_v9 = vld [vmem:[%s1047_s2 + $0xc] ss:$16 sps:$4 sm:$0xff]   ;;  %v726_v11 = vld [vmem:[%s1047_s2 + $0x8] ss:$16 sps:$4 sm:$0xff]   ;;  %256 = vmatprep.subr.bf16.mxu0 %v721_v6  ;;  %v727_v12 = vld [vmem:[%s1047_s2 + $0x24] ss:$16 sps:$4 sm:$0xff]  }
   0x4   :  { %26 = vadd.xlane.f32.xlu0 %v22_v3  ;;  %30 = vadd.xlane.f32.xlu1 %v24_v4  ;;  %v729_v13 = vld [vmem:[%s1047_s2 + $0x2c] ss:$16 sps:$4 sm:$0xff]   ;;  %v731_v14 = vld [vmem:[%s1047_s2 + $0x20] ss:$16 sps:$4 sm:$0xff]   ;;  %v732_v15 = vld [vmem:[%s1047_s2 + $0x28] ss:$16 sps:$4 sm:$0xff]  }
   0x5   :  { %309 = vmatprep.subr.bf16.mxu1 %v723_v9  ;;  %257 = vmatpush1.bf16.msra.mxu0 %v725_v10  ;;  %v733_v16 = vld [vmem:[%s1047_s2 + $0x44] ss:$16 sps:$4 sm:$0xff]   ;;  %v735_v17 = vld [vmem:[%s1047_s2 + $0x4c] ss:$16 sps:$4 sm:$0xff]   ;;  %v737_v18 = vld [vmem:[%s1047_s2 + $0x40] ss:$16 sps:$4 sm:$0xff]  }
   0x6   :  { %310 = vmatpush1.bf16.msra.mxu1 %v726_v11  ;;  %258 = vmatprep.subr.bf16.mxu0 %v727_v12  ;;  %v738_v19 = vld [vmem:[%s1047_s2 + $0x48] ss:$16 sps:$4 sm:$0xff]   ;;  %v739_v20 = vld [vmem:[%s1047_s2 + $0x64] ss:$16 sps:$4 sm:$0xff]   ;;  %v741_v21 = vld [vmem:[%s1047_s2 + $0x6c] ss:$16 sps:$4 sm:$0xff]  }
   0x7   :  { %311 = vmatprep.subr.bf16.mxu1 %v729_v13  ;;  %v743_v22 = vld [vmem:[%s1047_s2 + $0x60] ss:$16 sps:$4 sm:$0xff]   ;;  %v744_v23 = vld [vmem:[%s1047_s2 + $0x68] ss:$16 sps:$4 sm:$0xff]   ;;  %v745_v24 = vld [vmem:[%s1047_s2 + $0x84] ss:$16 sps:$4 sm:$0xff]  }
   0x8   :  { %28 = vadd.xlane.f32.xlu0 %v23_v7  ;;  %32 = vadd.xlane.f32.xlu1 %v25_v8  ;;  %v747_v25 = vld [vmem:[%s1047_s2 + $0x8c] ss:$16 sps:$4 sm:$0xff]   ;;  %v749_v26 = vld [vmem:[%s1047_s2 + $0x80] ss:$16 sps:$4 sm:$0xff]   ;;  %v750_v27 = vld [vmem:[%s1047_s2 + $0x88] ss:$16 sps:$4 sm:$0xff]  }
   0x9   :  { %259 = vmatpush1.bf16.msra.mxu0 %v731_v14  ;;  %v751_v28 = vld [vmem:[%s1047_s2 + $0xa4] ss:$16 sps:$4 sm:$0xff]   ;;  %v753_v29 = vld [vmem:[%s1047_s2 + $0xac] ss:$16 sps:$4 sm:$0xff]   ;;  %v755_v30 = vld [vmem:[%s1047_s2 + $0xa0] ss:$16 sps:$4 sm:$0xff]  }
   0xa   :  { %312 = vmatpush1.bf16.msra.mxu1 %v732_v15  ;;  %260 = vmatprep.subr.bf16.mxu0 %v733_v16  ;;  %v756_v31 = vld [vmem:[%s1047_s2 + $0xa8] ss:$16 sps:$4 sm:$0xff]   ;;  %v757_v32 = vld [vmem:[%s1047_s2 + $0xc4] ss:$16 sps:$4 sm:$0xff]   ;;  %v759_v33 = vld [vmem:[%s1047_s2 + $0xcc] ss:$16 sps:$4 sm:$0xff]  }
   0xb   :  { %313 = vmatprep.subr.bf16.mxu1 %v735_v17  ;;  %v761_v34 = vld [vmem:[%s1047_s2 + $0xc0] ss:$16 sps:$4 sm:$0xff]   ;;  %v762_v35 = vld [vmem:[%s1047_s2 + $0xc8] ss:$16 sps:$4 sm:$0xff]   ;;  %v763_v36 = vld [vmem:[%s1047_s2 + $0xe4] ss:$16 sps:$4 sm:$0xff]  }
   0xc   :  { %v765_v37 = vld [vmem:[%s1047_s2 + $0xec] ss:$16 sps:$4 sm:$0xff]   ;;  %v767_v39 = vld [vmem:[%s1047_s2 + $0xe0] ss:$16 sps:$4 sm:$0xff]   ;;  %v768_v40 = vld [vmem:[%s1047_s2 + $0xe8] ss:$16 sps:$4 sm:$0xff]  }
   0xd   :  { %261 = vmatpush1.bf16.msra.mxu0 %v737_v18  ;;  %v619_v56 = vld [vmem:[%s1048_s1] ss:$0 sm:$0xff]  ;;  %v771_v10 = vld [vmem:[%s1049_s3 + $0x48] sm:$0xff]   ;;  %v773_v12 = vld [vmem:[%s1049_s3 + $0x50] sm:$0xff]  }
   0xe   :  { %314 = vmatpush1.bf16.msra.mxu1 %v738_v19  ;;  %262 = vmatprep.subr.bf16.mxu0 %v739_v20  ;;  %v769_v8 = vld [vmem:[%s1049_s3 + $0x40] sm:$0xff]   ;;  %v772_v11 = vld [vmem:[%s1049_s3 + $0x8] sm:$0xff]   ;;  %v774_v13 = vld [vmem:[%s1049_s3 + $0x10] sm:$0xff]  }
   0xf   :  { %315 = vmatprep.subr.bf16.mxu1 %v741_v21  ;;  %v770_v9 = vld [vmem:[%s1049_s3] sm:$0xff]   ;;  %v775_v14 = vld [vmem:[%s1049_s3 + $0x58] sm:$0xff]   ;;  %v779_v18 = vld [vmem:[%s1049_s3 + $0x68] sm:$0xff]  }
  0x10   :  { %v776_v15 = vld [vmem:[%s1049_s3 + $0x18] sm:$0xff]   ;;  %v777_v16 = vld [vmem:[%s1049_s3 + $0x60] sm:$0xff]   ;;  %v780_v19 = vld [vmem:[%s1049_s3 + $0x28] sm:$0xff]  }
  0x11   :  { %263 = vmatpush1.bf16.msra.mxu0 %v743_v22  ;;  %v778_v17 = vld [vmem:[%s1049_s3 + $0x20] sm:$0xff]   ;;  %v781_v20 = vld [vmem:[%s1049_s3 + $0x70] sm:$0xff]   ;;  %v783_v22 = vld [vmem:[%s1049_s3 + $0x78] sm:$0xff]  }
  0x12   :  { %316 = vmatpush1.bf16.msra.mxu1 %v744_v23  ;;  %264 = vmatprep.subr.bf16.mxu0 %v745_v24  ;;  %v782_v21 = vld [vmem:[%s1049_s3 + $0x30] sm:$0xff]   ;;  %v784_v23 = vld [vmem:[%s1049_s3 + $0x38] sm:$0xff]  }
  0x13   :  { %317 = vmatprep.subr.bf16.mxu1 %v747_v25 }
  0x15   :  { %265 = vmatpush1.bf16.msra.mxu0 %v749_v26 }
  0x16   :  { %318 = vmatpush1.bf16.msra.mxu1 %v750_v27  ;;  %266 = vmatprep.subr.bf16.mxu0 %v751_v28 }
  0x17   :  { %319 = vmatprep.subr.bf16.mxu1 %v753_v29 }
  0x19   :  { %267 = vmatpush1.bf16.msra.mxu0 %v755_v30 }
  0x1a   :  { %320 = vmatpush1.bf16.msra.mxu1 %v756_v31  ;;  %268 = vmatprep.subr.bf16.mxu0 %v757_v32 }
  0x1b   :  { %321 = vmatprep.subr.bf16.mxu1 %v759_v33 }
  0x1d   :  { %269 = vmatpush1.bf16.msra.mxu0 %v761_v34 }
  0x1e   :  { %322 = vmatpush1.bf16.msra.mxu1 %v762_v35  ;;  %270 = vmatprep.subr.bf16.mxu0 %v763_v36 }
  0x1f   :  { %323 = vmatprep.subr.bf16.mxu1 %v765_v37 }
  0x21   :  { %271 = vmatpush1.bf16.msra.mxu0 %v767_v39 }
  0x22   :  { %324 = vmatpush1.bf16.msra.mxu1 %v768_v40  ;;  %676 = vmatprep.subr.bf16.mxu0 %v769_v8 }
  0x23   :  { %704 = vmatprep.subr.bf16.mxu1 %v769_v8 }
  0x91   :  { %v27_v41 = vpop.xlane.xlu0 %26  ;;  %v31_v42 = vpop.xlane.xlu1 %30 }
  0x92   :  { %v35_v43 = vmul.f32 0.0078125, %v27_v41  ;;  %v37_v44 = vmul.f32 0.0078125, %v31_v42 }
  0x94   :  { %v39_v45 = vadd.f32 1e-06, %v35_v43  ;;  %v41_v50 = vadd.f32 1e-06, %v37_v44 }
  0x95   :  { %v29_v46 = vpop.xlane.xlu0 %28  ;;  %v33_v47 = vpop.xlane.xlu1 %32 }
  0x96   :  { %785 = vrsqrt.f32 %v39_v45  ;;  %v36_v48 = vmul.f32 0.0078125, %v29_v46  ;;  %v38_v49 = vmul.f32 0.0078125, %v33_v47 }
  0x98   :  { %v40_v51 = vadd.f32 1e-06, %v36_v48  ;;  %v42_v52 = vadd.f32 1e-06, %v38_v49 }
  0x9a   :  { %787 = vrsqrt.f32 %v40_v51 }
  0x9b   :  { %789 = vrsqrt.f32 %v41_v50 }
  0x9c   :  { %791 = vrsqrt.f32 %v42_v52 }
  0xa0   :  { %v786_v53 = vpop.eup %785 }
  0xa1   :  { %v47_v54 = vmul.f32 %v786_v53, %v854_v0 }
  0xa3   :  { %v58_v60 = vmul.f32 %v619_v56, %v47_v54 }
  0xa4   :  { %v788_v55 = vpop.eup %787 }
  0xa5   :  { %v790_v57 = vpop.eup %789  ;;  %v48_v58 = vmul.f32 %v788_v55, %v864_v2 }
  0xa6   :  { %v792_v59 = vpop.eup %791  ;;  %v49_v63 = vmul.f32 %v790_v57, %v859_v1 }
  0xa7   :  { %v59_v61 = vmul.f32 %v619_v56, %v48_v58  ;;  %v50_v3 = vmul.f32 %v792_v59, %v873_v5 }
  0xa8   :  { %v60_v4 = vmul.f32 %v619_v56, %v49_v63 }
  0xa9   :  { %v62_v62 = vpack.c.bf16 %v59_v61, %v58_v60  ;;  %v61_v6 = vmul.f32 %v619_v56, %v50_v3 }
  0xab   :  { %289 = vmatmul.mubr.bf16.vlgmr.msra.gmra.mrb[0].mxu0 %v62_v62  ;;  %342 = vmatmul.mubr.bf16.vlgmr.msra.gmra.mrb[0].mxu1 %v62_v62  ;;  %v63_v7 = vpack.c.bf16 %v61_v6, %v60_v4 }
  0xac   :  { %298 = vmatprep.mubr.bf16.mxu0 %v825_v38  ;;  %351 = vmatprep.mubr.bf16.mxu1 %v825_v38 }
  0xad   :  { %677 = vmatpush3.bf16.msra.mxu0 %v770_v9  ;;  %712 = vmatpush3.bf16.msra.mxu1 %v770_v9 }
  0xae   :  { %678 = vmatprep.subr.bf16.mxu0 %v771_v10  ;;  %705 = vmatprep.subr.bf16.mxu1 %v771_v10 }
  0xb1   :  { %679 = vmatpush3.bf16.msra.mxu0 %v772_v11  ;;  %713 = vmatpush3.bf16.msra.mxu1 %v772_v11 }
  0xb2   :  { %680 = vmatprep.subr.bf16.mxu0 %v773_v12  ;;  %706 = vmatprep.subr.bf16.mxu1 %v773_v12 }
  0xb3   :  { %299 = vmatmul.mubr.bf16.gmra.mrb[4].mxu0 %v63_v7  ;;  %352 = vmatmul.mubr.bf16.gmra.mrb[4].mxu1 %v63_v7 }
  0xb5   :  { %681 = vmatpush3.bf16.msra.mxu0 %v774_v13  ;;  %714 = vmatpush3.bf16.msra.mxu1 %v774_v13 }
  0xb6   :  { %682 = vmatprep.subr.bf16.mxu0 %v775_v14  ;;  %707 = vmatprep.subr.bf16.mxu1 %v775_v14 }
  0xb9   :  { %683 = vmatpush3.bf16.msra.mxu0 %v776_v15  ;;  %715 = vmatpush3.bf16.msra.mxu1 %v776_v15 }
  0xba   :  { %684 = vmatprep.subr.bf16.mxu0 %v777_v16  ;;  %708 = vmatprep.subr.bf16.mxu1 %v777_v16 }
  0xbd   :  { %685 = vmatpush3.bf16.msra.mxu0 %v778_v17  ;;  %716 = vmatpush3.bf16.msra.mxu1 %v778_v17 }
  0xbe   :  { %686 = vmatprep.subr.bf16.mxu0 %v779_v18  ;;  %709 = vmatprep.subr.bf16.mxu1 %v779_v18 }
  0xc1   :  { %687 = vmatpush3.bf16.msra.mxu0 %v780_v19  ;;  %717 = vmatpush3.bf16.msra.mxu1 %v780_v19 }
  0xc2   :  { %688 = vmatprep.subr.bf16.mxu0 %v781_v20  ;;  %710 = vmatprep.subr.bf16.mxu1 %v781_v20 }
  0xc5   :  { %689 = vmatpush3.bf16.msra.mxu0 %v782_v21  ;;  %718 = vmatpush3.bf16.msra.mxu1 %v782_v21 }
  0xc6   :  { %690 = vmatprep.subr.bf16.mxu0 %v783_v22  ;;  %711 = vmatprep.subr.bf16.mxu1 %v783_v22 }
  0xc9   :  { %691 = vmatpush3.bf16.msra.mxu0 %v784_v23  ;;  %719 = vmatpush3.bf16.msra.mxu1 %v784_v23 }
 0x17e   :  { %v290_v24 = vpop.f32.mrb[0].mxu0  ;;  %v343_v25 = vpop.f32.mrb[0].mxu1 }
 0x17f   :  { %v652_v26 = vmul.f32 -1.442695, %v290_v24  ;;  %v292_v27 = vpop.f32.mrb[1].mxu0  ;;  %v345_v28 = vpop.f32.mrb[1].mxu1 }
 0x180   :  { %v653_v29 = vmul.f32 -1.442695, %v292_v27  ;;  %v294_v30 = vpop.f32.mrb[2].mxu0  ;;  %v347_v31 = vpop.f32.mrb[2].mxu1 }
 0x181   :  { %793 = vpow2.f32 %v652_v26  ;;  %v654_v32 = vmul.f32 -1.442695, %v294_v30  ;;  %v296_v33 = vpop.f32.mrb[3].mxu0  ;;  %v349_v34 = vpop.f32.mrb[3].mxu1 }
 0x182   :  { %795 = vpow2.f32 %v653_v29  ;;  %v655_v35 = vmul.f32 -1.442695, %v296_v33 }
 0x183   :  { %797 = vpow2.f32 %v654_v32 }
 0x184   :  { %799 = vpow2.f32 %v655_v35 }
 0x186   :  { %v300_v36 = vpop.f32.mrb[4].mxu0  ;;  %v353_v37 = vpop.f32.mrb[4].mxu1 }
 0x187   :  { %v656_v38 = vmul.f32 -1.442695, %v300_v36  ;;  %v302_v39 = vpop.f32.mrb[5].mxu0  ;;  %v355_v40 = vpop.f32.mrb[5].mxu1 }
 0x188   :  { %v657_v41 = vmul.f32 -1.442695, %v302_v39  ;;  %v304_v42 = vpop.f32.mrb[6].mxu0  ;;  %v357_v43 = vpop.f32.mrb[6].mxu1 }
 0x189   :  { %801 = vpow2.f32 %v656_v38  ;;  %v658_v44 = vmul.f32 -1.442695, %v304_v42  ;;  %v306_v45 = vpop.f32.mrb[7].mxu0  ;;  %v359_v46 = vpop.f32.mrb[7].mxu1 }
 0x18a   :  { %803 = vpow2.f32 %v657_v41  ;;  %v659_v47 = vmul.f32 -1.442695, %v306_v45 }
 0x18b   :  { %v794_v48 = vpop.eup %793  ;;  %805 = vpow2.f32 %v658_v44 }
 0x18c   :  { %v796_v49 = vpop.eup %795  ;;  %v386_v50 = vadd.f32 1.0, %v794_v48  ;;  %807 = vpow2.f32 %v659_v47 }
 0x18d   :  { %v798_v51 = vpop.eup %797  ;;  %v387_v52 = vadd.f32 1.0, %v796_v49 }
 0x18e   :  { %v800_v53 = vpop.eup %799  ;;  %809 = vrcp.f32 %v386_v50  ;;  %v388_v54 = vadd.f32 1.0, %v798_v51 }
 0x18f   :  { %811 = vrcp.f32 %v387_v52  ;;  %v389_v55 = vadd.f32 1.0, %v800_v53 }
 0x190   :  { %813 = vrcp.f32 %v388_v54 }
 0x191   :  { %815 = vrcp.f32 %v389_v55 }
 0x193   :  { %v802_v56 = vpop.eup %801 }
 0x194   :  { %v804_v57 = vpop.eup %803  ;;  %v390_v58 = vadd.f32 1.0, %v802_v56 }
 0x195   :  { %v806_v59 = vpop.eup %805  ;;  %v391_v60 = vadd.f32 1.0, %v804_v57 }
 0x196   :  { %v808_v61 = vpop.eup %807  ;;  %817 = vrcp.f32 %v390_v58  ;;  %v392_v62 = vadd.f32 1.0, %v806_v59 }
 0x197   :  { %819 = vrcp.f32 %v391_v60  ;;  %v393_v63 = vadd.f32 1.0, %v808_v61 }
 0x198   :  { %v810_v3 = vpop.eup %809  ;;  %821 = vrcp.f32 %v392_v62 }
 0x199   :  { %v812_v4 = vpop.eup %811  ;;  %v410_v6 = vmul.f32 %v810_v3, %v290_v24  ;;  %823 = vrcp.f32 %v393_v63 }
 0x19a   :  { %v814_v7 = vpop.eup %813  ;;  %v411_v8 = vmul.f32 %v812_v4, %v292_v27 }
 0x19b   :  { %v816_v9 = vpop.eup %815  ;;  %v418_v10 = vmul.f32 %v410_v6, %v343_v25  ;;  %v412_v11 = vmul.f32 %v814_v7, %v294_v30 }
 0x19c   :  { %v419_v12 = vmul.f32 %v411_v8, %v345_v28  ;;  %v413_v13 = vmul.f32 %v816_v9, %v296_v33 }
 0x19d   :  { %v420_v14 = vmul.f32 %v412_v11, %v347_v31 }
 0x19e   :  { %v421_v15 = vmul.f32 %v413_v13, %v349_v34 }
 0x19f   :  { %v426_v16 = vpack.c.bf16 %v420_v14, %v418_v10 }
 0x1a0   :  { %v818_v17 = vpop.eup %817  ;;  %v427_v18 = vpack.c.bf16 %v421_v15, %v419_v12 }
 0x1a1   :  { %v820_v19 = vpop.eup %819  ;;  %v414_v20 = vmul.f32 %v818_v17, %v300_v36 }
 0x1a2   :  { %v822_v21 = vpop.eup %821  ;;  %v415_v22 = vmul.f32 %v820_v19, %v302_v39  ;;  %590 = vmatprep.mubr.bf16.mxu0 %v427_v18 }
 0x1a3   :  { %v824_v23 = vpop.eup %823  ;;  %v422_v24 = vmul.f32 %v414_v20, %v353_v37  ;;  %v416_v26 = vmul.f32 %v822_v21, %v304_v42  ;;  %591 = vmatmul.mubr.bf16.vlgmr.msra.gmra.mrb[8].mxu0 %v426_v16 }
 0x1a4   :  { %v423_v27 = vmul.f32 %v415_v22, %v355_v40  ;;  %v417_v29 = vmul.f32 %v824_v23, %v306_v45 }
 0x1a5   :  { %v424_v25 = vmul.f32 %v416_v26, %v357_v43 }
 0x1a6   :  { %v425_v30 = vmul.f32 %v417_v29, %v359_v46 }
 0x1a7   :  { %v428_v28 = vpack.c.bf16 %v424_v25, %v422_v24 }
 0x1a8   :  { %v429_v32 = vpack.c.bf16 %v425_v30, %v423_v27 }
 0x1aa   :  { %598 = vmatprep.mubr.bf16.mxu1 %v429_v32 }
 0x1ab   :  { %599 = vmatmul.mubr.bf16.vlgmr.msra.gmra.mrb[8].mxu1 %v428_v28 }
 0x276   :  { %v692_v31 = vpop.f32.mrb[8].mxu0 }
 0x277   :  { %v693_v33 = vpop.f32.mrb[9].mxu0 }
 0x278   :  { %v694_v34 = vadd.f32 %v693_v33, %v692_v31  ;;  %v695_v35 = vpop.f32.mrb[10].mxu0 }
 0x279   :  { %v696_v36 = vpop.f32.mrb[11].mxu0 }
 0x27a   :  { %v607_v38 = vadd.f32 %v694_v34, %v854_v0  ;;  %v697_v39 = vadd.f32 %v696_v36, %v695_v35 }
 0x27c   :  { %611 = vst [vmem:[%s1050_s4] sm:$0xff] %v607_v38  ;;  %v608_v37 = vadd.f32 %v697_v39, %v864_v2 }
 0x27e   :  { %612 = vst [vmem:[%s1050_s4 + $0x8] sm:$0xff] %v608_v37  ;;  %v698_v40 = vpop.f32.mrb[8].mxu1 }
 0x27f   :  { %v699_v41 = vpop.f32.mrb[9].mxu1 }
 0x280   :  { %v700_v42 = vadd.f32 %v699_v41, %v698_v40  ;;  %v701_v43 = vpop.f32.mrb[10].mxu1 }
 0x281   :  { %v702_v44 = vpop.f32.mrb[11].mxu1 }
 0x282   :  { %v609_v45 = vadd.f32 %v700_v42, %v859_v1  ;;  %v703_v46 = vadd.f32 %v702_v44, %v701_v43 }
 0x284   :  { %613 = vst [vmem:[%s1050_s4 + $0x10] sm:$0xff] %v609_v45  ;;  %v610_v0 = vadd.f32 %v703_v46, %v873_v5 }
 0x286   :  { %614 = vst [vmem:[%s1050_s4 + $0x18] sm:$0xff] %v610_v0 }

// kernel: decoder_forward.5
= control target key start
LH: loop header
LB: loop body
LE: loop exit
PB: predicated region body
PF: predicated region fallthrough
CT: control target
= control target key end

     0   :  { %s1823_s21 = smov 0   ;;  %s2251_s0 = inlined_call_operand.vmem [shape: f32[2,16,128], index: 0, kind: input, shape index: {}]   ;;  %s2252_s1 = inlined_call_operand.vmem [shape: f32[1,128], index: 1, kind: input, shape index: {}]   ;;  %s2253_s2 = inlined_call_operand.vmem [shape: bf16[128,384], index: 2, kind: input, shape index: {}]   ;;  %s2254_s3 = inlined_call_operand.vmem [shape: bf16[128,128], index: 3, kind: input, shape index: {}]   ;;  %s2255_s4 = inlined_call_operand.vmem [shape: f32[16,32], index: 4, kind: input, shape index: {}]   ;;  %s2256_s5 = inlined_call_operand.vmem [shape: f32[16,32], index: 5, kind: input, shape index: {}]   ;;  %s2257_s6 = inlined_call_operand.vmem [shape: f32[2,16,128], index: 6, kind: output, shape index: {}]  }
   0x1 LB: > { %s1483_s22 = sadd.s32 4294967295, %s1776_s21   ;;  %p1487_p0 = scmp.ge.s32.totalorder %s1776_s21, 1  ;;  %s1776_s21 = sphi %s1823_s21, %s16_s21  }
   0x2   : > { %p212_p1 = scmp.lt.s32.totalorder %s1776_s21, 3 }
   0x4   : > { %p213_p2 = pnand %p1487_p0, %p212_p1 }
   0x5   : > { %p242_p3 = scmp.lt.s32.totalorder (!%p213_p2), %s1483_s22, 1  ;;  %v1692_v0 = vld [vmem:[%s2253_s2 + $0x4] ss:$12 sps:$4 sm:$0xff] (!%p213_p2)   ;;  %v1778_v1 = vmov (!%p213_p2), 0.0   ;;  %v1694_v2 = vld [vmem:[%s2253_s2] ss:$12 sps:$4 sm:$0xff] (!%p213_p2)  }
   0x6   : > { %216 = sbr.rel (%p213_p2) target bundleno = 2253 (0x8cd), region = 44  ;;  %1571 = vmatprep.subr.bf16.mxu1 (!%p213_p2), %v1778_v1  ;;  %440 = vmatprep.subr.bf16.mxu0 (!%p213_p2), %v1692_v0  ;;  %v1695_v3 = vld [vmem:[%s2253_s2 + $0x8] ss:$12 sps:$4 sm:$0xff] (!%p213_p2)   ;;  %v1698_v5 = vld [vmem:[%s2253_s2 + $0x18] ss:$12 sps:$4 sm:$0xff] (!%p213_p2)   ;;  %v1779_v24 = vmov (!%p213_p2), 0  }
   0x7   : > { %441 = vmatpush1.bf16.msra.mxu0 (!%p213_p2), %v1694_v2  ;;  %v1696_v4 = vld [vmem:[%s2253_s2 + $0x1c] ss:$12 sps:$4 sm:$0xff] (!%p213_p2)   ;;  %1572 = vmatpush3.bf16.msra.mxu1 (!%p213_p2), %v1695_v3  ;;  %v1699_v6 = vld [vmem:[%s2253_s2 + $0x20] ss:$12 sps:$4 sm:$0xff] (!%p213_p2)   ;;  %v1703_v13 = vld [vmem:[%s2253_s2 + $0x38] ss:$12 sps:$4 sm:$0xff] (!%p213_p2)  }
   0x8   : > { %442 = vmatprep.subr.bf16.mxu0 (!%p213_p2), %v1696_v4  ;;  %1573 = vmatprep.subr.bf16.mxu1 (!%p213_p2), %v1778_v1  ;;  %v1700_v11 = vld [vmem:[%s2253_s2 + $0x34] ss:$12 sps:$4 sm:$0xff] (!%p213_p2)   ;;  %v1702_v12 = vld [vmem:[%s2253_s2 + $0x30] ss:$12 sps:$4 sm:$0xff] (!%p213_p2)   ;;  %v1704_v14 = vld [vmem:[%s2253_s2 + $0x4c] ss:$12 sps:$4 sm:$0xff] (!%p213_p2)  }
   0x9   : > { %v1706_v15 = vld [vmem:[%s2253_s2 + $0x48] ss:$12 sps:$4 sm:$0xff] (!%p213_p2)   ;;  %v1707_v16 = vld [vmem:[%s2253_s2 + $0x50] ss:$12 sps:$4 sm:$0xff] (!%p213_p2)   ;;  %v1710_v18 = vld [vmem:[%s2253_s2 + $0x60] ss:$12 sps:$4 sm:$0xff] (!%p213_p2)   ;;  %472 = vmatprep.mubr.bf16.mxu0 (!%p213_p2), %v1779_v24 }
   0xa   : > { %v1708_v17 = vld [vmem:[%s2253_s2 + $0x64] ss:$12 sps:$4 sm:$0xff] (!%p213_p2)   ;;  %v1711_v19 = vld [vmem:[%s2253_s2 + $0x68] ss:$12 sps:$4 sm:$0xff] (!%p213_p2)   ;;  %v1715_v22 = vld [vmem:[%s2253_s2 + $0x80] ss:$12 sps:$4 sm:$0xff] (!%p213_p2)  }
   0xb   : > { %443 = vmatpush1.bf16.msra.mxu0 (!%p213_p2), %v1698_v5  ;;  %1574 = vmatpush3.bf16.msra.mxu1 (!%p213_p2), %v1699_v6  ;;  %v1712_v20 = vld [vmem:[%s2253_s2 + $0x7c] ss:$12 sps:$4 sm:$0xff] (!%p213_p2)   ;;  %v1714_v21 = vld [vmem:[%s2253_s2 + $0x78] ss:$12 sps:$4 sm:$0xff] (!%p213_p2)   ;;  %v1716_v23 = vld [vmem:[%s2253_s2 + $0x94] ss:$12 sps:$4 sm:$0xff] (!%p213_p2)  }
   0xc   : > { %1575 = vmatprep.subr.bf16.mxu1 (!%p213_p2), %v1778_v1  ;;  %444 = vmatprep.subr.bf16.mxu0 (!%p213_p2), %v1700_v11  ;;  %vm1780_vm0 = vmmov (!%p213_p2), 0   ;;  %v1718_v25 = vld [vmem:[%s2253_s2 + $0x90] ss:$12 sps:$4 sm:$0xff] (!%p213_p2)   ;;  %v1719_v26 = vld [vmem:[%s2253_s2 + $0x98] ss:$12 sps:$4 sm:$0xff] (!%p213_p2)   ;;  %s1781_s12 = smov (!%p213_p2), 16  }
   0xd   : > { %s2259_s22 = smov (!%p242_p3, %s1483_s22), 1  ;;  %1587 = vmatprep.mubr.msk.bf16.mxu1 %vm1780_vm0, %v1778_v1  ;;  %v1720_v27 = vld [vmem:[%s2253_s2 + $0xac] ss:$12 sps:$4 sm:$0xff]   ;;  %v1722_v28 = vld [vmem:[%s2253_s2 + $0xa8] ss:$12 sps:$4 sm:$0xff]   ;;  %s1782_s13 = smov 112  }
   0xe   : > { %s1535_s9 = sshll.u32 %s2259_s22, 4  ;;  %v1723_v29 = vld [vmem:[%s2253_s2 + $0xb0] ss:$12 sps:$4 sm:$0xff]   ;;  %v1492_v39 = vld [vmem:[%s2252_s1] ss:$0 sm:$0xff]  ;;  %s1783_s15 = smov 80  }
   0xf   : > { %s1858_s14 = scalar_lea.vmem %s2251_s0, %s1535_s9  ;;  %445 = vmatpush1.bf16.msra.mxu0 %v1702_v12  ;;  %1576 = vmatpush3.bf16.msra.mxu1 %v1703_v13  ;;  %s1784_s16 = smov 48   ;;  %vm553_vm1 = vcmask 130048   ;;  %v1991_v62 = vld [vmem:[%s2256_s5] sm:$0xff]  ;;  %v2002_v2 = vld [vmem:[%s2255_s4 + $0x8] sm:$0xff]  ;;  %vm592_vm2 = vcmask 261120   ;;  %vm1312_vm5 = vcmask 523264  }
  0x10   : > { %v1862_v7 = vld [vmem:[%s1858_s14] sm:$0xff]  ;;  %v1865_v8 = vld [vmem:[%s1858_s14 + $0x8] sm:$0xff]  ;;  %1577 = vmatprep.subr.bf16.mxu1 %v1778_v1  ;;  %446 = vmatprep.subr.bf16.mxu0 %v1704_v14  ;;  %s1785_s27 = smov 32   ;;  %s1786_s28 = smov 64   ;;  %vm1315_vm6 = vcmask 785408  }
  0x11   : > { %v255_v9 = vmul.f32 %v1862_v7, %v1862_v7  ;;  %v256_v10 = vmul.f32 %v1865_v8, %v1865_v8  ;;  %v1997_v0 = vld [vmem:[%s2255_s4] sm:$0xff]  ;;  %v2007_v3 = vld [vmem:[%s2256_s5 + $0x8] sm:$0xff]  ;;  %s1787_s29 = smov 96  }
  0x13   : > { %257 = vadd.xlane.f32.xlu0 %v255_v9  ;;  %447 = vmatpush1.bf16.msra.mxu0 %v1706_v15 }
  0x14   : > { %1578 = vmatpush3.bf16.msra.mxu1 %v1707_v16  ;;  %448 = vmatprep.subr.bf16.mxu0 %v1708_v17 }
  0x15   : > { %1579 = vmatprep.subr.bf16.mxu1 %v1778_v1 }
  0x17   : > { %259 = vadd.xlane.f32.xlu0 %v256_v10  ;;  %449 = vmatpush1.bf16.msra.mxu0 %v1710_v18 }
  0x18   : > { %1580 = vmatpush3.bf16.msra.mxu1 %v1711_v19  ;;  %450 = vmatprep.subr.bf16.mxu0 %v1712_v20 }
  0x19   : > { %1581 = vmatprep.subr.bf16.mxu1 %v1778_v1 }
  0x1b   : > { %451 = vmatpush1.bf16.msra.mxu0 %v1714_v21 }
  0x1c   : > { %1582 = vmatpush3.bf16.msra.mxu1 %v1715_v22  ;;  %452 = vmatprep.subr.bf16.mxu0 %v1716_v23 }
  0x1d   : > { %1583 = vmatprep.subr.bf16.mxu1 %v1778_v1 }
  0x1f   : > { %453 = vmatpush1.bf16.msra.mxu0 %v1718_v25 }
  0x20   : > { %1584 = vmatpush3.bf16.msra.mxu1 %v1719_v26  ;;  %454 = vmatprep.subr.bf16.mxu0 %v1720_v27 }
  0x21   : > { %1585 = vmatprep.subr.bf16.mxu1 %v1778_v1 }
  0x23   : > { %455 = vmatpush1.bf16.msra.mxu0 %v1722_v28 }
  0x24   : > { %1586 = vmatpush3.bf16.msra.mxu1 %v1723_v29  ;;  %1615 = vmatprep.subr.bf16.mxu0 %v1778_v1 }
  0x25   : > { %1591 = vmatprep.subr.bf16.mxu1 %v1778_v1 }
  0xa0   : > { %v258_v30 = vpop.xlane.xlu0 %257 }
  0xa1   : > { %v262_v31 = vmul.f32 0.0078125, %v258_v30 }
  0xa3   : > { %v264_v32 = vadd.f32 1e-06, %v262_v31  ;;  %v528_v31 = vlaneseq }
  0xa4   : > { %v260_v33 = vpop.xlane.xlu0 %259 }
  0xa5   : > { %1732 = vrsqrt.f32 %v264_v32  ;;  %v263_v34 = vmul.f32 0.0078125, %v260_v33 }
  0xa7   : > { %v265_v35 = vadd.f32 1e-06, %v263_v34  ;;  %v2031_v34 = vshrl.u32 %v528_v31, 7 }
  0xa9   : > { %1734 = vrsqrt.f32 %v265_v35  ;;  %v2033_v35 = vand.u32 127, %v528_v31 }
  0xab   : > { %vm533_vm3 = vcmp.le.s32.totalorder %v2033_v35, %v2031_v34 }
  0xaf   : > { %v1733_v36 = vpop.eup %1732 }
  0xb0   : > { %v268_v37 = vmul.f32 %v1733_v36, %v1862_v7 }
  0xb2   : > { %v277_v41 = vmul.f32 %v1492_v39, %v268_v37  ;;  %v2036_v37 = vadd.s32 8, %v2031_v34 }
  0xb3   : > { %v1735_v38 = vpop.eup %1734 }
  0xb4   : > { %v269_v40 = vmul.f32 %v1735_v38, %v1865_v8  ;;  %vm534_vm4 = vcmp.le.s32.totalorder %v2033_v35, %v2036_v37 }
  0xb6   : > { %v278_v42 = vmul.f32 %v1492_v39, %v269_v40 }
  0xb8   : > { %v279_v43 = vpack.c.bf16 %v278_v42, %v277_v41 }
  0xba   : > { %473 = vmatmul.mubr.bf16.vlgmr.msra.gmra.mrb[0].mxu0 %v279_v43  ;;  %1588 = vmatmul.mubr.bf16.vlgmr.msra.gmra.mrb[0].mxu1 %v279_v43 }
  0xbb   : > { %1593 = vmatprep.mubr.msk.bf16.mxu1 %vm1780_vm0, %v1778_v1  ;;  %1617 = vmatprep.mubr.msk.bf16.mxu0 %vm1780_vm0, %v1778_v1 }
 0x18d   : > { %v1944_v44 = vpop.f32.mrb[0].mxu0  ;;  %v517_v45 = vpop.f32.mrb[0].mxu1 }
 0x18e   : > { %v1946_v46 = vpop.f32.mrb[1].mxu0  ;;  %v1589_v47 = vpop.f32.mrb[1].mxu1  ;;  %v535_v48 = vsub.f32 0.0, %v1944_v44  ;;  %v556_v16 = vmul.f32 %v1997_v0, %v1944_v44 }
 0x18f   : > { %v520_v49 = vpop.f32.mrb[2].mxu1  ;;  %576 = vrot.lane.b32.xlu0 %v1946_v46, %s1781_s12  ;;  %v1951_v50 = vpop.f32.mrb[2].mxu0  ;;  %v564_v54 = vsub.f32 0.0, %v1946_v46  ;;  %v584_v7 = vmul.f32 %v1997_v0, %v1946_v46 }
 0x190   : > { %v1953_v51 = vpack.c.bf16 %v520_v49, %v517_v45  ;;  %v1590_v52 = vpop.f32.mrb[3].mxu1  ;;  %539 = vrot.lane.b32.xlu1 %v535_v48, %s1782_s13  ;;  %v1955_v53 = vpop.f32.mrb[3].mxu0  ;;  %v536_v55 = vsub.f32 0.0, %v1951_v50  ;;  %v557_v21 = vmul.f32 %v2002_v2, %v1951_v50 }
 0x191   : > { %v565_v56 = vsub.f32 0.0, %v1955_v53  ;;  %v585_v8 = vmul.f32 %v2002_v2, %v1955_v53 }
 0x193   : > { %756 = vrot.lane.b32.xlu0 %v1955_v53, %s1782_s13 }
 0x194   : > { %568 = vrot.lane.b32.xlu1 %v564_v54, %s1782_s13 }
 0x197   : > { %710 = vrot.lane.b32.xlu0 %v535_v48, %s1783_s15 }
 0x198   : > { %578 = vrot.lane.b32.xlu1 %v1955_v53, %s1781_s12 }
 0x19b   : > { %718 = vrot.lane.b32.xlu0 %v1951_v50, %s1782_s13 }
 0x19c   : > { %541 = vrot.lane.b32.xlu1 %v536_v55, %s1782_s13 }
 0x19f   : > { %948 = vrot.lane.b32.xlu0 %v1955_v53, %s1783_s15 }
 0x1a0   : > { %570 = vrot.lane.b32.xlu1 %v565_v56, %s1782_s13 }
 0x1a3   : > { %906 = vrot.lane.b32.xlu0 %v536_v55, %s1784_s16 }
 0x1a4   : > { %547 = vrot.lane.b32.xlu1 %v1944_v44, %s1781_s12 }
 0x1a7   : > { %912 = vrot.lane.b32.xlu0 %v1951_v50, %s1783_s15 }
 0x1a8   : > { %549 = vrot.lane.b32.xlu1 %v1951_v50, %s1781_s12 }
 0x1ab   : > { %1139 = vrot.lane.b32.xlu0 %v1955_v53, %s1784_s16 }
 0x1ac   : > { %748 = vrot.lane.b32.xlu1 %v564_v54, %s1783_s15 }
 0x1af   : > { %1097 = vrot.lane.b32.xlu0 %v536_v55, %s1781_s12 }
 0x1b0   : > { %754 = vrot.lane.b32.xlu1 %v1946_v46, %s1782_s13 }
 0x1b3   : > { %750 = vrot.lane.b32.xlu0 %v565_v56, %s1783_s15 }
 0x1b4   : > { %712 = vrot.lane.b32.xlu1 %v536_v55, %s1783_s15 }
 0x1b7   : > { %942 = vrot.lane.b32.xlu0 %v565_v56, %s1784_s16 }
 0x1b8   : > { %716 = vrot.lane.b32.xlu1 %v1944_v44, %s1782_s13 }
 0x1bb   : > { %1133 = vrot.lane.b32.xlu0 %v565_v56, %s1781_s12 }
 0x1bc   : > { %940 = vrot.lane.b32.xlu1 %v564_v54, %s1784_s16 }
 0x1c0   : > { %946 = vrot.lane.b32.xlu1 %v1946_v46, %s1783_s15 }
 0x1c4   : > { %904 = vrot.lane.b32.xlu1 %v535_v48, %s1784_s16 }
 0x1c8   : > { %910 = vrot.lane.b32.xlu1 %v1944_v44, %s1783_s15 }
 0x1cc   : > { %1131 = vrot.lane.b32.xlu1 %v564_v54, %s1781_s12 }
 0x1d0   : > { %1137 = vrot.lane.b32.xlu1 %v1946_v46, %s1784_s16 }
 0x1d4   : > { %1095 = vrot.lane.b32.xlu1 %v535_v48, %s1781_s12 }
 0x1d8   : > { %1101 = vrot.lane.b32.xlu1 %v1944_v44, %s1784_s16 }
 0x201   : > { %v577_v60 = vpop.permute.xlu0 %576 }
 0x202   : > { %v540_v57 = vpop.permute.xlu1 %539 }
 0x205   : > { %v757_v28 = vpop.permute.xlu0 %756 }
 0x206   : > { %v569_v58 = vpop.permute.xlu1 %568 }
 0x207   : > { %v582_v63 = vsel %vm553_vm1, %v569_v58, %v577_v60 }
 0x208   : > { %v586_v4 = vmul.f32 %v582_v63, %v1991_v62 }
 0x209   : > { %v711_v30 = vpop.permute.xlu0 %710 }
 0x20a   : > { %v579_v59 = vpop.permute.xlu1 %578  ;;  %v588_v10 = vadd.f32 %v586_v4, %v584_v7 }
 0x20d   : > { %v719_v33 = vpop.permute.xlu0 %718 }
 0x20e   : > { %v542_v61 = vpop.permute.xlu1 %541 }
 0x211   : > { %v949_v38 = vpop.permute.xlu0 %948 }
 0x212   : > { %v571_v5 = vpop.permute.xlu1 %570 }
 0x213   : > { %v583_v6 = vsel %vm553_vm1, %v571_v5, %v579_v59 }
 0x214   : > { %v587_v9 = vmul.f32 %v583_v6, %v2007_v3 }
 0x215   : > { %v907_v47 = vpop.permute.xlu0 %906 }
 0x216   : > { %v589_v11 = vadd.f32 %v587_v9, %v585_v8  ;;  %v548_v12 = vpop.permute.xlu1 %547 }
 0x217   : > { %v554_v13 = vsel %vm553_vm1, %v540_v57, %v548_v12 }
 0x218   : > { %v558_v14 = vmul.f32 %v554_v13, %v1991_v62  ;;  %v591_v15 = vpack.c.bf16 %v589_v11, %v588_v10 }
 0x219   : > { %v913_v55 = vpop.permute.xlu0 %912 }
 0x21a   : > { %v550_v17 = vpop.permute.xlu1 %549  ;;  %v597_v18 = vsel %vm592_vm2, %v591_v15, 0  ;;  %v560_v20 = vadd.f32 %v558_v14, %v556_v16 }
 0x21b   : > { %v555_v19 = vsel %vm553_vm1, %v542_v61, %v550_v17  ;;  %1592 = vmatpush3.bf16.xpose.msra.mxu1 %v597_v18 }
 0x21c   : > { %v559_v22 = vmul.f32 %v555_v19, %v2007_v3  ;;  %1597 = vmatprep.subr.bf16.mxu1 %v1778_v1  ;;  %v562_v24 = vmul.f32 0.17677669, %v560_v20 }
 0x21d   : > { %v1140_v57 = vpop.permute.xlu0 %1139 }
 0x21e   : > { %v561_v23 = vadd.f32 %v559_v22, %v557_v21  ;;  %v749_v27 = vpop.permute.xlu1 %748  ;;  %v917_v22 = vsel %vm553_vm1, %v907_v47, %v913_v55 }
 0x220   : > { %v563_v25 = vmul.f32 0.17677669, %v561_v23 }
 0x221   : > { %v1098_v60 = vpop.permute.xlu0 %1097 }
 0x222   : > { %v590_v26 = vpack.c.bf16 %v563_v25, %v562_v24  ;;  %v755_v29 = vpop.permute.xlu1 %754  ;;  %v927_v25 = vmul.f32 %v917_v22, %v2007_v3 }
 0x223   : > { %v760_v58 = vsel %vm553_vm1, %v749_v27, %v755_v29 }
 0x224   : > { %1594 = vmatmul.mubr.msk.bf16.vlgmr.msra.gmra.mrb[4].mxu1 %vm592_vm2, %v590_v26  ;;  %v764_v61 = vmul.f32 %v760_v58, %v1991_v62 }
 0x225   : > { %1598 = vmatpush3.bf16.msra.mxu1 %v1953_v51  ;;  %1599 = vmatprep.mubr.msk.bf16.mxu1 %vm1780_vm0, %v1778_v1  ;;  %v751_v6 = vpop.permute.xlu0 %750 }
 0x226   : > { %1603 = vmatprep.subr.bf16.mxu1 %v1778_v1  ;;  %v713_v32 = vpop.permute.xlu1 %712  ;;  %v761_v7 = vsel %vm553_vm1, %v751_v6, %v757_v28 }
 0x227   : > { %v765_v10 = vmul.f32 %v761_v7, %v2007_v3  ;;  %v723_v11 = vsel %vm553_vm1, %v713_v32, %v719_v33 }
 0x228   : > { %v735_v14 = vmul.f32 %v723_v11, %v2007_v3 }
 0x229   : > { %v943_v17 = vpop.permute.xlu0 %942 }
 0x22a   : > { %v717_v36 = vpop.permute.xlu1 %716  ;;  %v953_v18 = vsel %vm553_vm1, %v943_v17, %v949_v38 }
 0x22b   : > { %v722_v63 = vsel %vm553_vm1, %v711_v30, %v717_v36  ;;  %v957_v21 = vmul.f32 %v953_v18, %v2007_v3 }
 0x22c   : > { %v734_v4 = vmul.f32 %v722_v63, %v1991_v62 }
 0x22d   : > { %v1134_v27 = vpop.permute.xlu0 %1133 }
 0x22e   : > { %v941_v42 = vpop.permute.xlu1 %940 }
 0x232   : > { %v947_v54 = vpop.permute.xlu1 %946 }
 0x233   : > { %v952_v8 = vsel %vm553_vm1, %v941_v42, %v947_v54 }
 0x234   : > { %v956_v12 = vmul.f32 %v952_v8, %v1991_v62 }
 0x236   : > { %v905_v56 = vpop.permute.xlu1 %904 }
 0x23a   : > { %v911_v59 = vpop.permute.xlu1 %910 }
 0x23b   : > { %v916_v13 = vsel %vm553_vm1, %v905_v56, %v911_v59 }
 0x23c   : > { %v926_v15 = vmul.f32 %v916_v13, %v1991_v62 }
 0x23e   : > { %v1132_v5 = vpop.permute.xlu1 %1131 }
 0x242   : > { %v1138_v9 = vpop.permute.xlu1 %1137 }
 0x243   : > { %v1143_v19 = vsel %vm553_vm1, %v1132_v5, %v1138_v9 }
 0x244   : > { %v1147_v23 = vmul.f32 %v1143_v19, %v1991_v62 }
 0x246   : > { %v1096_v16 = vpop.permute.xlu1 %1095 }
 0x24a   : > { %v1102_v20 = vpop.permute.xlu1 %1101 }
 0x24b   : > { %v1107_v24 = vsel %vm553_vm1, %v1096_v16, %v1102_v20 }
 0x24c   : > { %v1117_v26 = vmul.f32 %v1107_v24, %v1991_v62 }
 0x2f7   : > { %v633_v39 = vpop.f32.mrb[4].mxu1 }
 0x2f8   : > { %v2045_v40 = vsel %vm533_vm3, %v633_v39, -1e+30  ;;  %v1595_v41 = vpop.f32.mrb[5].mxu1 }
 0x2f9   : > { %v636_v43 = vpop.f32.mrb[6].mxu1  ;;  %v642_v45 = vsel %vm553_vm1, %v2045_v40, -inf }
 0x2fa   : > { %v2052_v48 = vsel %vm534_vm4, %v636_v43, -1e+30  ;;  %643 = vmax.xlane.f32.xlu1 %v642_v45  ;;  %v1596_v49 = vpop.f32.mrb[7].mxu1 }
 0x2fb   : > { %v645_v52 = vsel %vm553_vm1, %v2052_v48, -inf }
 0x2fc   : > { %646 = vmax.xlane.f32.xlu0 %v645_v52 }
 0x30b   : > { %726 = vrot.lane.b32.xlu1 %v1997_v0, %s1785_s27 }
 0x30f   : > { %768 = vrot.lane.b32.xlu1 %v764_v61, %s1785_s27 }
 0x312   : > { %1103 = vrot.lane.b32.xlu0 %v1951_v50, %s1784_s16 }
 0x313   : > { %738 = vrot.lane.b32.xlu1 %v734_v4, %s1785_s27 }
 0x316   : > { %728 = vrot.lane.b32.xlu0 %v2002_v2, %s1785_s27 }
 0x317   : > { %918 = vrot.lane.b32.xlu1 %v1997_v0, %s1786_s28 }
 0x31a   : > { %770 = vrot.lane.b32.xlu0 %v765_v10, %s1785_s27 }
 0x31b   : > { %960 = vrot.lane.b32.xlu1 %v956_v12, %s1786_s28 }
 0x31e   : > { %740 = vrot.lane.b32.xlu0 %v735_v14, %s1785_s27 }
 0x31f   : > { %930 = vrot.lane.b32.xlu1 %v926_v15, %s1786_s28 }
 0x322   : > { %920 = vrot.lane.b32.xlu0 %v2002_v2, %s1786_s28 }
 0x323   : > { %1109 = vrot.lane.b32.xlu1 %v1997_v0, %s1787_s29  ;;  %v1144_v0 = vsel %vm553_vm1, %v1134_v27, %v1140_v57 }
 0x324   : > { %v1148_v28 = vmul.f32 %v1144_v0, %v2007_v3 }
 0x326   : > { %962 = vrot.lane.b32.xlu0 %v957_v21, %s1786_s28 }
 0x327   : > { %1151 = vrot.lane.b32.xlu1 %v1147_v23, %s1787_s29 }
 0x32a   : > { %932 = vrot.lane.b32.xlu0 %v927_v25, %s1786_s28 }
 0x32b   : > { %1121 = vrot.lane.b32.xlu1 %v1117_v26, %s1787_s29 }
 0x32e   : > { %1111 = vrot.lane.b32.xlu0 %v2002_v2, %s1787_s29 }
 0x332   : > { %1153 = vrot.lane.b32.xlu0 %v1148_v28, %s1787_s29 }
 0x387   : > { %v644_v29 = vpop.xlane.xlu1 %643 }
 0x388   : > { %v648_v30 = vsub.f32 %v2045_v40, %v644_v29 }
 0x389   : > { %v647_v31 = vpop.xlane.xlu0 %646 }
 0x38a   : > { %v650_v32 = vmul.f32 1.442695, %v648_v30  ;;  %v649_v59 = vsub.f32 %v2052_v48, %v647_v31 }
 0x38b   : > { %v727_v62 = vpop.permute.xlu1 %726 }
 0x38c   : > { %1736 = vpow2.f32 %v650_v32  ;;  %v762_v42 = vmul.f32 %v727_v62, %v1946_v46  ;;  %v732_v47 = vmul.f32 %v727_v62, %v1944_v44  ;;  %v652_v6 = vmul.f32 1.442695, %v649_v59 }
 0x38d   : > { %v1104_v33 = vpop.permute.xlu0 %1103 }
 0x38e   : > { %v1108_v36 = vsel %vm553_vm1, %v1098_v60, %v1104_v33  ;;  %1738 = vpow2.f32 %v652_v6 }
 0x38f   : > { %v1118_v38 = vmul.f32 %v1108_v36, %v2007_v3  ;;  %v769_v39 = vpop.permute.xlu1 %768 }
 0x390   : > { %v774_v49 = vadd.f32 %v769_v39, %v762_v42 }
 0x391   : > { %v729_v41 = vpop.permute.xlu0 %728  ;;  %1123 = vrot.lane.b32.xlu0 %v1118_v38, %s1787_s29 }
 0x392   : > { %v763_v43 = vmul.f32 %v729_v41, %v1955_v53  ;;  %v733_v55 = vmul.f32 %v729_v41, %v1951_v50 }
 0x393   : > { %v739_v2 = vpop.permute.xlu1 %738 }
 0x394   : > { %v744_v56 = vadd.f32 %v739_v2, %v732_v47 }
 0x395   : > { %v771_v45 = vpop.permute.xlu0 %770 }
 0x396   : > { %v2109_v40 = vpop.eup %1736  ;;  %v775_v52 = vadd.f32 %v771_v45, %v763_v43  ;;  %v746_v63 = vmul.f32 0.17677669, %v744_v56 }
 0x397   : > { %v919_v54 = vpop.permute.xlu1 %918  ;;  %v654_v3 = vsel %vm553_vm1, %v2109_v40, 0.0 }
 0x398   : > { %v777_v57 = vpack.c.bf16 %v775_v52, %v774_v49  ;;  %655 = vadd.xlane.f32.xlu1 %v654_v3  ;;  %v954_v9 = vmul.f32 %v919_v54, %v1946_v46  ;;  %v924_v12 = vmul.f32 %v919_v54, %v1944_v44  ;;  %v1739_v27 = vpop.eup %1738 }
 0x399   : > { %v741_v58 = vpop.permute.xlu0 %740  ;;  %v657_v31 = vsel %vm553_vm1, %v1739_v27, 0.0 }
 0x39a   : > { %v745_v60 = vadd.f32 %v741_v58, %v733_v55 }
 0x39b   : > { %v961_v61 = vpop.permute.xlu1 %960 }
 0x39c   : > { %v747_v4 = vmul.f32 0.17677669, %v745_v60  ;;  %v966_v13 = vadd.f32 %v961_v61, %v954_v9 }
 0x39d   : > { %v921_v5 = vpop.permute.xlu0 %920 }
 0x39e   : > { %v776_v7 = vpack.c.bf16 %v747_v4, %v746_v63  ;;  %v955_v10 = vmul.f32 %v921_v5, %v1955_v53  ;;  %v925_v48 = vmul.f32 %v921_v5, %v1951_v50 }
 0x39f   : > { %v931_v8 = vpop.permute.xlu1 %930 }
 0x3a0   : > { %v936_v16 = vadd.f32 %v931_v8, %v924_v12 }
 0x3a1   : > { %v963_v11 = vpop.permute.xlu0 %962 }
 0x3a2   : > { %v967_v14 = vadd.f32 %v963_v11, %v955_v10  ;;  %v938_v21 = vmul.f32 0.17677669, %v936_v16 }
 0x3a3   : > { %v1110_v15 = vpop.permute.xlu1 %1109 }
 0x3a4   : > { %v969_v17 = vpack.c.bf16 %v967_v14, %v966_v13  ;;  %v1115_v18 = vmul.f32 %v1110_v15, %v1944_v44  ;;  %v1145_v0 = vmul.f32 %v1110_v15, %v1946_v46 }
 0x3a5   : > { %v933_v19 = vpop.permute.xlu0 %932 }
 0x3a6   : > { %v937_v20 = vadd.f32 %v933_v19, %v925_v48 }
 0x3a7   : > { %v1152_v26 = vpop.permute.xlu1 %1151 }
 0x3a8   : > { %v939_v22 = vmul.f32 0.17677669, %v937_v20  ;;  %v1157_v44 = vadd.f32 %v1152_v26, %v1145_v0 }
 0x3a9   : > { %v1112_v23 = vpop.permute.xlu0 %1111  ;;  %779 = vrot.lane.b32.xlu1 %v776_v7, %s1787_s29 }
 0x3aa   : > { %v968_v24 = vpack.c.bf16 %v939_v22, %v938_v21  ;;  %v1116_v25 = vmul.f32 %v1112_v23, %v1951_v50  ;;  %v1146_v28 = vmul.f32 %v1112_v23, %v1955_v53 }
 0x3ab   : > { %v1122_v50 = vpop.permute.xlu1 %1121 }
 0x3ac   : > { %v1127_v62 = vadd.f32 %v1122_v50, %v1115_v18 }
 0x3ad   : > { %v1154_v29 = vpop.permute.xlu0 %1153  ;;  %974 = vrot.lane.b32.xlu1 %v969_v17, %s1786_s28 }
 0x3ae   : > { %v1158_v30 = vadd.f32 %v1154_v29, %v1146_v28  ;;  %v1129_v53 = vmul.f32 0.17677669, %v1127_v62 }
 0x3b0   : > { %v1160_v32 = vpack.c.bf16 %v1158_v30, %v1157_v44  ;;  %658 = vadd.xlane.f32.xlu0 %v657_v31 }
 0x3b2   : > { %1165 = vrot.lane.b32.xlu1 %v1160_v32, %s1785_s27 }
 0x3c6   : > { %782 = vrot.lane.b32.xlu0 %v777_v57, %s1787_s29 }
 0x3ca   : > { %971 = vrot.lane.b32.xlu0 %v968_v24, %s1786_s28 }
 0x403   : > { %v1124_v46 = vpop.permute.xlu0 %1123 }
 0x404   : > { %v1128_v33 = vadd.f32 %v1124_v46, %v1116_v25 }
 0x406   : > { %v1130_v36 = vmul.f32 0.17677669, %v1128_v33 }
 0x408   : > { %v1159_v38 = vpack.c.bf16 %v1130_v36, %v1129_v53 }
 0x40a   : > { %1162 = vrot.lane.b32.xlu0 %v1159_v38, %s1785_s27 }
 0x425   : > { %v656_v39 = vpop.xlane.xlu1 %655 }
 0x426   : > { %1740 = vrcp.f32 %v656_v39 }
 0x429   : > { %v780_v41 = vpop.permute.xlu1 %779 }
 0x42d   : > { %v975_v2 = vpop.permute.xlu1 %974 }
 0x42e   : > { %v980_v42 = vsel %vm592_vm2, %v975_v2, 0 }
 0x42f   : > { %1616 = vmatpush3.bf16.xpose.msra.mxu0 %v980_v42 }
 0x430   : > { %1627 = vmatprep.subr.bf16.mxu0 %v1778_v1  ;;  %v1741_v52 = vpop.eup %1740 }
 0x431   : > { %v1166_v47 = vpop.permute.xlu1 %1165  ;;  %v662_v55 = vmul.f32 %v1741_v52, %v2109_v40 }
 0x432   : > { %v1171_v54 = vsel %vm592_vm2, %v1166_v47, 0 }
 0x43d   : > { %v659_v43 = vpop.xlane.xlu0 %658 }
 0x43e   : > { %1742 = vrcp.f32 %v659_v43 }
 0x441   : > { %v783_v45 = vpop.permute.xlu0 %782 }
 0x442   : > { %v788_v58 = vsel %vm592_vm2, %v783_v45, 0 }
 0x445   : > { %v972_v49 = vpop.permute.xlu0 %971 }
 0x446   : > { %1618 = vmatmul.mubr.msk.bf16.vlgmr.msra.gmra.mrb[4].mxu0 %vm592_vm2, %v972_v49 }
 0x447   : > { %1628 = vmatpush3.bf16.xpose.msra.mxu0 %v1171_v54  ;;  %1629 = vmatprep.mubr.msk.bf16.mxu0 %vm1780_vm0, %v1778_v1 }
 0x448   : > { %v1743_v3 = vpop.eup %1742  ;;  %1639 = vmatprep.subr.bf16.mxu0 %v1778_v1 }
 0x449   : > { %v663_v56 = vmul.f32 %v1743_v3, %v1739_v27 }
 0x44b   : > { %v664_v57 = vpack.c.bf16 %v663_v56, %v662_v55 }
 0x44d   : > { %1600 = vmatmul.mubr.msk.bf16.vlgmr.msra.gmra.mrb[8].mxu1 %vm553_vm1, %v664_v57 }
 0x44e   : > { %1604 = vmatpush3.bf16.xpose.msra.mxu1 %v788_v58  ;;  %1605 = vmatprep.mubr.msk.bf16.mxu1 %vm1780_vm0, %v1778_v1 }
 0x44f   : > { %1609 = vmatprep.subr.bf16.mxu1 %v1778_v1 }
 0x455   : > { %1606 = vmatmul.mubr.msk.bf16.vlgmr.msra.gmra.mrb[12].mxu1 %vm592_vm2, %v780_v41 }
 0x456   : > { %1611 = vmatprep.mubr.msk.bf16.mxu1 %vm1780_vm0, %v1778_v1 }
 0x47c   : > { %v1163_v59 = vpop.permute.xlu0 %1162 }
 0x47d   : > { %1630 = vmatmul.mubr.msk.bf16.vlgmr.msra.gmra.mrb[8].mxu0 %vm592_vm2, %v1163_v59 }
 0x47e   : > { %1655 = vmatprep.mubr.msk.bf16.mxu0 %vm1780_vm0, %v1778_v1 }
 0x519   : > { %v1016_v40 = vpop.f32.mrb[4].mxu0 }
 0x51a   : > { %v1619_v60 = vpop.f32.mrb[5].mxu0  ;;  %v1023_v16 = vsel %vm533_vm3, %v1016_v40, -1e+30 }
 0x51b   : > { %v1019_v61 = vpop.f32.mrb[6].mxu0  ;;  %v1025_v18 = vsel %vm553_vm1, %v1023_v16, -inf }
 0x51c   : > { %v1620_v63 = vpop.f32.mrb[7].mxu0  ;;  %v1024_v13 = vsel %vm534_vm4, %v1019_v61, -1e+30 }
 0x51d   : > { %v1028_v17 = vsel %vm553_vm1, %v1024_v13, -inf }
 0x520   : > { %v2150_v4 = vpop.f32.mrb[8].mxu1 }
 0x521   : > { %v1601_v5 = vpop.f32.mrb[9].mxu1 }
 0x522   : > { %v2152_v6 = vpop.f32.mrb[10].mxu1 }
 0x523   : > { %v1602_v7 = vpop.f32.mrb[11].mxu1 }
 0x528   : > { %v824_v8 = vpop.f32.mrb[12].mxu1 }
 0x529   : > { %v831_v9 = vsel %vm533_vm3, %v824_v8, -1e+30  ;;  %v1607_v10 = vpop.f32.mrb[13].mxu1 }
 0x52a   : > { %v827_v11 = vpop.f32.mrb[14].mxu1  ;;  %v833_v12 = vsel %vm553_vm1, %v831_v9, -inf }
 0x52b   : > { %v832_v14 = vsel %vm534_vm4, %v827_v11, -1e+30  ;;  %834 = vmax.xlane.f32.xlu1 %v833_v12  ;;  %v1608_v15 = vpop.f32.mrb[15].mxu1 }
 0x52c   : > { %v836_v48 = vsel %vm553_vm1, %v832_v14, -inf }
 0x52d   : > { %837 = vmax.xlane.f32.xlu0 %v836_v48 }
 0x52f   : > { %1029 = vmax.xlane.f32.xlu1 %v1028_v17 }
 0x531   : > { %1026 = vmax.xlane.f32.xlu0 %v1025_v18 }
 0x550   : > { %v1207_v19 = vpop.f32.mrb[8].mxu0 }
 0x551   : > { %v1214_v20 = vsel %vm533_vm3, %v1207_v19, -1e+30  ;;  %v1631_v21 = vpop.f32.mrb[9].mxu0 }
 0x552   : > { %v1210_v22 = vpop.f32.mrb[10].mxu0  ;;  %v1216_v23 = vsel %vm553_vm1, %v1214_v20, -inf  ;;  %v1725_v21 = vld [vmem:[%s2254_s3 + $0x8] sm:$0xff]  }
 0x553   : > { %v1215_v24 = vsel %vm534_vm4, %v1210_v22, -1e+30  ;;  %1217 = vmax.xlane.f32.xlu0 %v1216_v23  ;;  %v1632_v25 = vpop.f32.mrb[11].mxu0  ;;  %v1726_v22 = vld [vmem:[%s2254_s3 + $0x10] sm:$0xff]   ;;  %v1727_v23 = vld [vmem:[%s2254_s3 + $0x18] sm:$0xff]  }
 0x554   : > { %v1219_v26 = vsel %vm553_vm1, %v1215_v24, -inf }
 0x555   : > { %1220 = vmax.xlane.f32.xlu1 %v1219_v26 }
 0x5b8   : > { %v835_v27 = vpop.xlane.xlu1 %834 }
 0x5b9   : > { %v839_v62 = vsub.f32 %v831_v9, %v835_v27  ;;  %v1729_v27 = vld [vmem:[%s2254_s3 + $0x28] sm:$0xff]  }
 0x5ba   : > { %v838_v0 = vpop.xlane.xlu0 %837 }
 0x5bb   : > { %v840_v33 = vsub.f32 %v832_v14, %v838_v0  ;;  %v841_v36 = vmul.f32 1.442695, %v839_v62 }
 0x5bc   : > { %v1030_v28 = vpop.xlane.xlu1 %1029 }
 0x5bd   : > { %v1032_v29 = vsub.f32 %v1024_v13, %v1030_v28  ;;  %v843_v2 = vmul.f32 1.442695, %v840_v33 }
 0x5be   : > { %v1027_v44 = vpop.xlane.xlu0 %1026 }
 0x5bf   : > { %v1035_v34 = vmul.f32 1.442695, %v1032_v29  ;;  %v1031_v30 = vsub.f32 %v1023_v16, %v1027_v44  ;;  %v1730_v44 = vld [vmem:[%s2254_s3 + $0x30] sm:$0xff]  }
 0x5c1   : > { %1744 = vpow2.f32 %v1035_v34  ;;  %v1033_v31 = vmul.f32 1.442695, %v1031_v30 }
 0x5c3   : > { %1746 = vpow2.f32 %v1033_v31  ;;  %v1731_v31 = vld [vmem:[%s2254_s3 + $0x38] sm:$0xff]  }
 0x5cb   : > { %v2178_v32 = vpop.eup %1744 }
 0x5cc   : > { %v1040_v35 = vsel %vm553_vm1, %v2178_v32, 0.0 }
 0x5cd   : > { %v1747_v37 = vpop.eup %1746  ;;  %1041 = vadd.xlane.f32.xlu1 %v1040_v35 }
 0x5ce   : > { %v1037_v50 = vsel %vm553_vm1, %v1747_v37, 0.0 }
 0x5cf   : > { %1038 = vadd.xlane.f32.xlu0 %v1037_v50 }
 0x5e0   : > { %v1218_v46 = vpop.xlane.xlu0 %1217 }
 0x5e1   : > { %v1222_v53 = vsub.f32 %v1214_v20, %v1218_v46  ;;  %v1724_v20 = vld [vmem:[%s2254_s3] sm:$0xff]  }
 0x5e2   : > { %v1221_v38 = vpop.xlane.xlu1 %1220  ;;  %1640 = vmatpush3.bf16.msra.mxu0 %v1724_v20 }
 0x5e3   : > { %v1224_v39 = vmul.f32 1.442695, %v1222_v53  ;;  %v1223_v41 = vsub.f32 %v1215_v24, %v1221_v38  ;;  %1641 = vmatprep.subr.bf16.mxu0 %v1778_v1  ;;  %v1728_v24 = vld [vmem:[%s2254_s3 + $0x20] sm:$0xff]  }
 0x5e5   : > { %1748 = vpow2.f32 %v1224_v39  ;;  %v1226_v42 = vmul.f32 1.442695, %v1223_v41 }
 0x5e6   : > { %1750 = vpow2.f32 %v841_v36  ;;  %1642 = vmatpush3.bf16.msra.mxu0 %v1725_v21 }
 0x5e7   : > { %1752 = vpow2.f32 %v1226_v42  ;;  %1643 = vmatprep.subr.bf16.mxu0 %v1778_v1 }
 0x5e8   : > { %1754 = vpow2.f32 %v843_v2 }
 0x5ea   : > { %1644 = vmatpush3.bf16.msra.mxu0 %v1726_v22 }
 0x5eb   : > { %1645 = vmatprep.subr.bf16.mxu0 %v1778_v1 }
 0x5ee   : > { %1646 = vmatpush3.bf16.msra.mxu0 %v1727_v23 }
 0x5ef   : > { %v1749_v43 = vpop.eup %1748  ;;  %1647 = vmatprep.subr.bf16.mxu0 %v1778_v1 }
 0x5f0   : > { %v1751_v45 = vpop.eup %1750  ;;  %v1228_v47 = vsel %vm553_vm1, %v1749_v43, 0.0 }
 0x5f1   : > { %v1753_v49 = vpop.eup %1752  ;;  %1229 = vadd.xlane.f32.xlu0 %v1228_v47  ;;  %v845_v3 = vsel %vm553_vm1, %v1751_v45, 0.0 }
 0x5f2   : > { %v1231_v52 = vsel %vm553_vm1, %v1753_v49, 0.0  ;;  %v1755_v54 = vpop.eup %1754  ;;  %1648 = vmatpush3.bf16.msra.mxu0 %v1728_v24 }
 0x5f3   : > { %1232 = vadd.xlane.f32.xlu1 %v1231_v52  ;;  %v848_v55 = vsel %vm553_vm1, %v1755_v54, 0.0  ;;  %1649 = vmatprep.subr.bf16.mxu0 %v1778_v1 }
 0x5f5   : > { %846 = vadd.xlane.f32.xlu0 %v845_v3 }
 0x5f6   : > { %1650 = vmatpush3.bf16.msra.mxu0 %v1729_v27 }
 0x5f7   : > { %849 = vadd.xlane.f32.xlu1 %v848_v55  ;;  %1651 = vmatprep.subr.bf16.mxu0 %v1778_v1 }
 0x5fa   : > { %1652 = vmatpush3.bf16.msra.mxu0 %v1730_v44 }
 0x5fb   : > { %1653 = vmatprep.subr.bf16.mxu0 %v1778_v1 }
 0x5fe   : > { %1654 = vmatpush3.bf16.msra.mxu0 %v1731_v31 }
 0x608   : > { %1048 = vrot.lane.b32.xlu1 %v1953_v51, %s1786_s28 }
 0x60b   : > { %857 = vrot.lane.b32.xlu0 %v1953_v51, %s1787_s29 }
 0x60c   : > { %1239 = vrot.lane.b32.xlu1 %v1953_v51, %s1785_s27 }
 0x65a   : > { %v1042_v57 = vpop.xlane.xlu1 %1041 }
 0x65c   : > { %v1039_v56 = vpop.xlane.xlu0 %1038 }
 0x67e   : > { %v1230_v58 = vpop.xlane.xlu0 %1229 }
 0x680   : > { %v1233_v59 = vpop.xlane.xlu1 %1232 }
 0x682   : > { %v847_v40 = vpop.xlane.xlu0 %846 }
 0x683   : > { %1756 = vrcp.f32 %v847_v40 }
 0x684   : > { %v850_v60 = vpop.xlane.xlu1 %849 }
 0x685   : > { %1758 = vrcp.f32 %v850_v60 }
 0x686   : > { %v858_v61 = vpop.permute.xlu0 %857  ;;  %1760 = vrcp.f32 %v1039_v56 }
 0x687   : > { %1610 = vmatpush3.bf16.msra.mxu1 %v858_v61  ;;  %1762 = vrcp.f32 %v1042_v57 }
 0x688   : > { %1621 = vmatprep.subr.bf16.mxu1 %v1778_v1  ;;  %1764 = vrcp.f32 %v1233_v59  ;;  %v1049_v10 = vpop.permute.xlu1 %1048 }
 0x689   : > { %1766 = vrcp.f32 %v1230_v58  ;;  %v1768_v58 = vld [vmem:[%s1858_s14] sm:$0xff] }
 0x68c   : > { %v1240_v48 = vpop.permute.xlu1 %1239 }
 0x68d   : > { %v1757_v63 = vpop.eup %1756 }
 0x68e   : > { %v853_v7 = vmul.f32 %v1757_v63, %v1751_v45 }
 0x68f   : > { %v1759_v5 = vpop.eup %1758 }
 0x690   : > { %v854_v8 = vmul.f32 %v1759_v5, %v1755_v54  ;;  %v1761_v9 = vpop.eup %1760 }
 0x691   : > { %v1763_v11 = vpop.eup %1762  ;;  %v1045_v12 = vmul.f32 %v1761_v9, %v1747_v37 }
 0x692   : > { %v855_v51 = vpack.c.bf16 %v854_v8, %v853_v7  ;;  %v1046_v13 = vmul.f32 %v1763_v11, %v2178_v32  ;;  %v1765_v15 = vpop.eup %1764 }
 0x693   : > { %v1767_v16 = vpop.eup %1766  ;;  %v1237_v17 = vmul.f32 %v1765_v15, %v1753_v49 }
 0x694   : > { %1612 = vmatmul.mubr.msk.bf16.vlgmr.msra.gmra.mrb[16].mxu1 %vm553_vm1, %v855_v51  ;;  %v1047_v14 = vpack.c.bf16 %v1046_v13, %v1045_v12  ;;  %v1236_v18 = vmul.f32 %v1767_v16, %v1749_v43 }
 0x695   : > { %1622 = vmatpush3.bf16.msra.mxu1 %v1049_v10  ;;  %1623 = vmatprep.mubr.msk.bf16.mxu1 %vm1780_vm0, %v1778_v1 }
 0x696   : > { %1633 = vmatprep.subr.bf16.mxu1 %v1778_v1  ;;  %v1238_v19 = vpack.c.bf16 %v1237_v17, %v1236_v18 }
 0x69c   : > { %1624 = vmatmul.mubr.msk.bf16.vlgmr.msra.gmra.mrb[20].mxu1 %vm553_vm1, %v1047_v14 }
 0x69d   : > { %1634 = vmatpush3.bf16.msra.mxu1 %v1240_v48  ;;  %1635 = vmatprep.mubr.msk.bf16.mxu1 %vm1780_vm0, %v1778_v1 }
 0x6a4   : > { %1636 = vmatmul.mubr.msk.bf16.vlgmr.msra.gmra.mrb[24].mxu1 %vm553_vm1, %v1238_v19 }
 0x767   : > { %v897_v25 = vpop.f32.mrb[16].mxu1 }
 0x768   : > { %v1613_v26 = vpop.f32.mrb[17].mxu1 }
 0x769   : > { %v900_v0 = vpop.f32.mrb[18].mxu1 }
 0x76a   : > { %v1677_v28 = vpack.i.bf16 %v900_v0, %v897_v25  ;;  %v1614_v29 = vpop.f32.mrb[19].mxu1 }
 0x76c   : > { %1678 = vrot.lane.b32.xlu0 %v1677_v28, %s1785_s27 }
 0x76f   : > { %v1088_v34 = vpop.f32.mrb[20].mxu1 }
 0x770   : > { %v1625_v30 = vpop.f32.mrb[21].mxu1 }
 0x771   : > { %v1091_v32 = vpop.f32.mrb[22].mxu1 }
 0x772   : > { %v1682_v35 = vpack.i.bf16 %v1091_v32, %v1088_v34  ;;  %v1626_v37 = vpop.f32.mrb[23].mxu1 }
 0x774   : > { %1683 = vrot.lane.b32.xlu1 %v1682_v35, %s1786_s28  ;;  %s251_s28 = scalar_lea.vmem %s2257_s6, %s1535_s9 }
 0x777   : > { %v1279_v50 = vpop.f32.mrb[24].mxu1 }
 0x778   : > { %v1637_v62 = vpop.f32.mrb[25].mxu1 }
 0x779   : > { %v1282_v46 = vpop.f32.mrb[26].mxu1 }
 0x77a   : > { %v1687_v33 = vpack.i.bf16 %v1282_v46, %v1279_v50  ;;  %v1638_v53 = vpop.f32.mrb[27].mxu1 }
 0x77c   : > { %1688 = vrot.lane.b32.xlu0 %v1687_v33, %s1787_s29 }
 0x7de   : > { %v1679_v36 = vpop.permute.xlu0 %1678 }
 0x7df   : > { %v1681_v38 = vunpack.i.h.bf16 %v1679_v36  ;;  %v1680_v39 = vunpack.i.l.bf16 %v1679_v36 }
 0x7e1   : > { %v1311_v43 = vsel %vm592_vm2, %v2152_v6, %v1681_v38  ;;  %v1310_v45 = vsel %vm592_vm2, %v2150_v4, %v1680_v39  ;;  %v1769_v4 = vld [vmem:[%s1858_s14 + $0x8] sm:$0xff] }
 0x7e6   : > { %v1684_v1 = vpop.permute.xlu1 %1683 }
 0x7e7   : > { %v1686_v41 = vunpack.i.h.bf16 %v1684_v1  ;;  %v1685_v2 = vunpack.i.l.bf16 %v1684_v1 }
 0x7e9   : > { %v1314_v52 = vsel %vm1312_vm5, %v1311_v43, %v1686_v41  ;;  %v1313_v54 = vsel %vm1312_vm5, %v1310_v45, %v1685_v2 }
 0x7ee   : > { %v1689_v42 = vpop.permute.xlu0 %1688 }
 0x7ef   : > { %v1691_v47 = vunpack.i.h.bf16 %v1689_v42  ;;  %v1690_v49 = vunpack.i.l.bf16 %v1689_v42 }
 0x7f1   : > { %v1316_v3 = vsel %vm1315_vm6, %v1313_v54, %v1690_v49  ;;  %v1317_v55 = vsel %vm1315_vm6, %v1314_v52, %v1691_v47 }
 0x7f2   : > { %v1318_v56 = vpack.c.bf16 %v1317_v55, %v1316_v3 }
 0x7f4   : > { %1656 = vmatmul.mubr.bf16.vlgmr.msra.gmra.mrb[12].mxu0 %v1318_v56 }
 0x8c7   : > { %v1417_v57 = vpop.f32.mrb[12].mxu0 }
 0x8c8   : > { %v1424_v6 = vadd.f32 %v1768_v58, %v1417_v57  ;;  %v1657_v59 = vpop.f32.mrb[13].mxu0 }
 0x8c9   : > { %v1420_v40 = vpop.f32.mrb[14].mxu0 }
 0x8ca   : > { %1426 = vst [vmem:[%s251_s28] sm:$0xff] %v1424_v6  ;;  %v1425_v60 = vadd.f32 %v1769_v4, %v1420_v40  ;;  %v1658_v61 = vpop.f32.mrb[15].mxu0 }
 0x8cc   : > { %1427 = vst [vmem:[%s251_s28 + $0x8] sm:$0xff] %v1425_v60 }
 0x8cd PF: > { %s16_s21 = sadd.s32 1, %s1776_s21  }
 0x8ce   : > { %p13_p4 = scmp.ge.s32.totalorder %s16_s21, 4  }
 0x8d0   :  { %15 = sbr.rel (!%p13_p4) target bundleno = 1 (0x1), region = 74 }

</bundles_post_ra>
